<compile_context>
chip_gen: v7x
topology: tpu7x:2x2x1
jax: 0.10.0
libtpu: 0.0.40
codegen_flags: <defaults>
</compile_context>

<pallas_src>
import jax
import jax.numpy as jnp
from jax import lax
from jax.experimental import pallas as pl
from jax.experimental.pallas import tpu as pltpu

# ---- small synthetic config (mirrors the GPTConfig fields the forward uses) ----
VOCAB = 16        # vocab_size
SEQ = 8           # max_len == sequence length
EMBED = 32        # embed_dim
HEADS = 4         # num_heads
HEAD_DIM = EMBED // HEADS
FFN = 64          # ffn_dim
NPROPS = 8        # num_props
NLAYERS = 5       # Encoder uses 5 EncoderLayers
MAX_REL = 20      # Attention.max_relative_position
EPS = 1e-5        # nn.LayerNorm default eps
NEG_INF = -1e9    # masked_fill value used by the reference
APPROX_RECIP = True   # softmax denom on the EUP; set False for exact validation runs


def _gelu_tanh(x):
    # nn.functional.gelu(x, approximate='tanh')
    c = 0.7978845608028654  # sqrt(2/pi)
    return 0.5 * x * (1.0 + jnp.tanh(c * (x + 0.044715 * x * x * x)))


def _layernorm(x, g, b):
    mu = jnp.mean(x, axis=-1, keepdims=True)
    var = jnp.mean((x - mu) ** 2, axis=-1, keepdims=True)
    return (x - mu) * lax.rsqrt(var + EPS) * g + b


# -------------------- fused Pallas kernel: full encoder + prop head --------------------
def smiles_bert_kernel(x_ref, mask_ref, relk_ref, relv_ref,
                       wqkv_ref, bqkv_ref, wo_ref, bo_ref,
                       ln1g_ref, ln1b_ref,
                       w1_ref, b1_ref, w2_ref, b2_ref,
                       ln2g_ref, ln2b_ref,
                       pw_ref, pb_ref, vp_ref,
                       logits_ref, sse_ref):
    f32, bf16 = jnp.float32, jnp.bfloat16
    S, E = x_ref.shape[1], x_ref.shape[2]
    H = HEADS
    D = E // H
    L = wqkv_ref.shape[0]
    inv_scale = jnp.float32(1.0 / (float(D) ** 0.5))

    x0 = x_ref[0]                       # [S, E] f32, VMEM-resident across all layers
    mask_bias = mask_ref[...]           # [1, 1, S] f32 additive bias (-1e9 at [PAD] keys)

    def layer(l, x):
        # fused Q|K|V projection: one [S,E]@[E,3E] MXU matmul (bf16 in, f32 acc)
        qkv = jnp.dot(x.astype(bf16), wqkv_ref[l],
                      preferred_element_type=f32) + bqkv_ref[l]          # [S, 3E]
        relk = relk_ref[l]                                               # [S, S, D] bf16
        relv = relv_ref[l]                                               # [S, S, D] bf16

        q_heads = [qkv[:, h * D:(h + 1) * D] for h in range(H)]
        k_heads = [qkv[:, E + h * D: E + (h + 1) * D] for h in range(H)]
        v_heads = [qkv[:, 2 * E + h * D: 2 * E + (h + 1) * D] for h in range(H)]

        # content->position scores for ALL heads: one batched MXU matmul,
        # batch dim = query position i (canonical 'bqd,bkd->bqk' form).
        q3 = jnp.stack(q_heads, axis=1).astype(bf16)                     # [S, H, D]
        attn2 = jnp.einsum('ihd,ijd->ihj', q3, relk,
                           preferred_element_type=f32)                   # [S, H, S]

        # content->content scores: per-head plain 2-D MXU matmuls (H is tiny/static).
        attn1 = jnp.stack(
            [jnp.einsum('id,jd->ij',
                        q_heads[h].astype(bf16), k_heads[h].astype(bf16),
                        preferred_element_type=f32)
             for h in range(H)], axis=1)                                 # [S, H, S]

        # head-collapsed masked softmax (stats in f32); additive pad-key bias.
        attn = (attn1 + attn2) * inv_scale + mask_bias                   # [S, H, S]
        attn = attn - jnp.max(attn, axis=-1, keepdims=True)
        p = jnp.exp(attn)
        p = p * pl.reciprocal(jnp.sum(p, axis=-1, keepdims=True), approx=APPROX_RECIP)
        p_bf = p.astype(bf16)

        # attn @ rel-V for ALL heads: one batched MXU matmul (batch = i).
        w2rel = jnp.einsum('ihj,ijd->ihd', p_bf, relv,
                           preferred_element_type=f32)                   # [S, H, D]

        # attn @ V per head (2-D MXU matmuls); fold heads back into one [S, E] slab.
        ctx = jnp.concatenate(
            [jnp.dot(p_bf[:, h, :], v_heads[h].astype(bf16),
                     preferred_element_type=f32) + w2rel[:, h, :]
             for h in range(H)], axis=-1)                                # [S, E]

        # single output projection over full E (no per-head K=D slices)
        attn_out = jnp.dot(ctx.astype(bf16), wo_ref[l],
                           preferred_element_type=f32) + bo_ref[l]       # [S, E]

        # residual + attn_norm
        h1 = _layernorm(x + attn_out, ln1g_ref[l], ln1b_ref[l])
        # FFN: Linear -> gelu(tanh) -> Linear
        ff = jnp.dot(h1.astype(bf16), w1_ref[l], preferred_element_type=f32) + b1_ref[l]
        ff = _gelu_tanh(ff)
        ff = jnp.dot(ff.astype(bf16), w2_ref[l], preferred_element_type=f32) + b2_ref[l]
        # residual + final_norm
        return _layernorm(h1 + ff, ln2g_ref[l], ln2b_ref[l])

    # TODO(synk): at production S, tile attention flash-style over key blocks and
    # (if [L,S,S,D] overflows VMEM, esp. v7x 64 MiB) move the rel-pos gather back
    # in-kernel as one [S*S,2R+1]@[2R+1,2D] matmul per layer.
    x = lax.fori_loop(0, L, layer, x0)

    # -------- prop head: mean over E, then [1,S] x [S,P] projection --------
    feat = jnp.sum(x, axis=-1, keepdims=True) * jnp.float32(1.0 / E)     # [S, 1]
    logits = jnp.sum(feat * pw_ref[...], axis=0, keepdims=True) + pb_ref[...]   # [1, P]
    logits_ref[0] = logits
    diff = logits - vp_ref[0]
    sse_ref[0] = jnp.sum(diff * diff, axis=-1, keepdims=True)            # [1, 1]


# -------------------- parameter setup (deterministic synthetic init) --------------------
def init_params(key):
    keys = iter(jax.random.split(key, 24))

    def nrm(shape, scale=0.02):
        return (scale * jax.random.normal(next(keys), shape)).astype(jnp.float32)

    L, E, F, R2, D = NLAYERS, EMBED, FFN, 2 * MAX_REL + 1, HEAD_DIM
    return {
        "tok_emb": nrm((VOCAB, E)),
        # matmul weights stored in bf16 (MXU operands); biases / LN params in f32
        "wqkv": nrm((L, E, 3 * E)).astype(jnp.bfloat16),   # [Wq | Wk | Wv], pre-transposed
        "bqkv": nrm((L, 1, 3 * E)),
        "wo":   nrm((L, E, E)).astype(jnp.bfloat16),
        "bo":   nrm((L, 1, E)),
        "relk": nrm((L, R2, D)),                           # relative_position_k tables
        "relv": nrm((L, R2, D)),                           # relative_position_v tables
        "ln1g": jnp.ones((L, 1, E), jnp.float32),
        "ln1b": jnp.zeros((L, 1, E), jnp.float32),
        "w1": nrm((L, E, F)).astype(jnp.bfloat16),
        "b1": nrm((L, 1, F)),
        "w2": nrm((L, F, E)).astype(jnp.bfloat16),
        "b2": nrm((L, 1, E)),
        "ln2g": jnp.ones((L, 1, E), jnp.float32),
        "ln2b": jnp.zeros((L, 1, E), jnp.float32),
        "prop_w": nrm((SEQ, NPROPS)),   # prop_proj weight pre-transposed [max_len, num_props]
        "prop_b": nrm((1, NPROPS)),
    }


def _cost_estimate(B):
    S, E, F, D, H, L, P = SEQ, EMBED, FFN, HEAD_DIM, HEADS, NLAYERS, NPROPS
    per_tok_mm = 2 * E * (3 * E + E + 2 * F)             # qkv + out-proj + ffn matmuls
    per_layer = B * (S * per_tok_mm + 8 * S * S * E)     # + attn1/attn2/p@v/p@relv
    flops = L * per_layer + B * (2 * S * P + S * E)
    transc = L * B * (H * S * S + S * F)                 # exp + tanh
    bytes_w = L * (2 * (3 * E * E + E * E + 2 * E * F) + 2 * 2 * S * S * D
                   + 4 * (3 * E + E + F + E + 4 * E))
    bytes_io = 4 * (B * S * E + B * S + 2 * B * P + B) + 4 * (S * P + P)
    return pl.CostEstimate(flops=int(flops), transcendentals=int(transc),
                           bytes_accessed=int(bytes_w + bytes_io))


def _fixed_spec(shape):
    zeros = (0,) * len(shape)
    return pl.BlockSpec(shape, lambda b, _z=zeros: _z)


# -------------------- full forward --------------------
def smiles_bert_forward(params, sca, v_prop_dict):
    B, S = sca.shape
    E, P, L, D, F = EMBED, NPROPS, NLAYERS, HEAD_DIM, FFN

    # plain-JAX glue: token-embedding gather, additive pad bias, v_prop dict -> tensor
    x0 = jnp.take(params["tok_emb"], sca, axis=0)                          # [B, S, E] f32
    mask_bias = (NEG_INF * (sca == 0).astype(jnp.float32))[:, None, :]     # [B, 1, S]
    vp = jnp.concatenate([v[:, None].astype(jnp.float32)
                          for v in v_prop_dict.values()], axis=1)          # [B, P]
    vp3 = vp[:, None, :]                                                   # [B, 1, P]

    # pre-gather relative-position tables (weight-only data) to [L, S, S, d]
    r = jnp.arange(S)
    dist = jnp.clip(r[None, :] - r[:, None], -MAX_REL, MAX_REL) + MAX_REL  # [S, S]
    relk_g = jnp.take(params["relk"], dist, axis=1).astype(jnp.bfloat16)   # [L, S, S, D]
    relv_g = jnp.take(params["relv"], dist, axis=1).astype(jnp.bfloat16)

    in_specs = [
        pl.BlockSpec((1, S, E), lambda b: (b, 0, 0)),        # x0 (batch-tiled)
        pl.BlockSpec((1, 1, S), lambda b: (b, 0, 0)),        # mask_bias
        _fixed_spec((L, S, S, D)),                           # relk_g (resident)
        _fixed_spec((L, S, S, D)),                           # relv_g
        _fixed_spec((L, E, 3 * E)),                          # wqkv
        _fixed_spec((L, 1, 3 * E)),                          # bqkv
        _fixed_spec((L, E, E)),                              # wo
        _fixed_spec((L, 1, E)),                              # bo
        _fixed_spec((L, 1, E)),                              # ln1g
        _fixed_spec((L, 1, E)),                              # ln1b
        _fixed_spec((L, E, F)),                              # w1
        _fixed_spec((L, 1, F)),                              # b1
        _fixed_spec((L, F, E)),                              # w2
        _fixed_spec((L, 1, E)),                              # b2
        _fixed_spec((L, 1, E)),                              # ln2g
        _fixed_spec((L, 1, E)),                              # ln2b
        _fixed_spec((S, P)),                                 # prop_w (pre-transposed)
        _fixed_spec((1, P)),                                 # prop_b
        pl.BlockSpec((1, 1, P), lambda b: (b, 0, 0)),        # v_prop
    ]
    out_specs = (
        pl.BlockSpec((1, 1, P), lambda b: (b, 0, 0)),        # logits (lane-dense, P last)
        pl.BlockSpec((1, 1, 1), lambda b: (b, 0, 0)),        # per-sample SSE
    )

    # TODO(synk): batch tile is 1 sample / grid step; on v6e/v7x grow the row slab
    # (stack several samples per step) once a leading-dim batched layout is added,
    # and budget the tile against 64 MiB VMEM on v7x (vmem_limit_bytes).
    logits3, sse = pl.pallas_call(
        smiles_bert_kernel,
        out_shape=(jax.ShapeDtypeStruct((B, 1, P), jnp.float32),
                   jax.ShapeDtypeStruct((B, 1, 1), jnp.float32)),
        grid=(B,),
        in_specs=in_specs,
        out_specs=out_specs,
        compiler_params=pltpu.CompilerParams(dimension_semantics=("parallel",)),
        cost_estimate=_cost_estimate(B),
    )(x0, mask_bias, relk_g, relv_g,
      params["wqkv"], params["bqkv"], params["wo"], params["bo"],
      params["ln1g"], params["ln1b"],
      params["w1"], params["b1"], params["w2"], params["b2"],
      params["ln2g"], params["ln2b"],
      params["prop_w"], params["prop_b"], vp3)

    logits = logits3.reshape(B, P)
    # MSELoss mean over all B*P elements, then sqrt (per-sample SSE summed here)
    rmse = jnp.sqrt(jnp.sum(sse) / (B * P))
    return logits, rmse


if __name__ == "__main__":
    key = jax.random.PRNGKey(0)
    pkey, tkey, vkey = jax.random.split(key, 3)
    params = init_params(pkey)

    B = 2
    sca = jax.random.randint(tkey, (B, SEQ), 1, VOCAB, dtype=jnp.int32)
    sca = sca.at[1, SEQ - 2:].set(0)   # a couple of [PAD] tokens to exercise the mask
    vp_vals = jax.random.normal(vkey, (B, NPROPS), dtype=jnp.float32)
    v_prop = {f"prop_{i}": vp_vals[:, i] for i in range(NPROPS)}

    logits, rmse = smiles_bert_forward(params, sca, v_prop)
    jax.block_until_ready((logits, rmse))
    assert logits.shape == (B, NPROPS) and rmse.shape == ()
    print("KERNEL_OK")
</pallas_src>

<mosaic_0001>
module attributes {stable_mosaic.version = 11 : i64} {
  func.func @smiles_bert_kernel(%arg0: i32, %arg1: memref<1x8x32xf32, #tpu.memory_space<vmem>>, %arg2: memref<1x1x8xf32, #tpu.memory_space<vmem>>, %arg3: memref<5x8x8x8xbf16, #tpu.memory_space<vmem>>, %arg4: memref<5x8x8x8xbf16, #tpu.memory_space<vmem>>, %arg5: memref<5x32x96xbf16, #tpu.memory_space<vmem>>, %arg6: memref<5x1x96xf32, #tpu.memory_space<vmem>>, %arg7: memref<5x32x32xbf16, #tpu.memory_space<vmem>>, %arg8: memref<5x1x32xf32, #tpu.memory_space<vmem>>, %arg9: memref<5x1x32xf32, #tpu.memory_space<vmem>>, %arg10: memref<5x1x32xf32, #tpu.memory_space<vmem>>, %arg11: memref<5x32x64xbf16, #tpu.memory_space<vmem>>, %arg12: memref<5x1x64xf32, #tpu.memory_space<vmem>>, %arg13: memref<5x64x32xbf16, #tpu.memory_space<vmem>>, %arg14: memref<5x1x32xf32, #tpu.memory_space<vmem>>, %arg15: memref<5x1x32xf32, #tpu.memory_space<vmem>>, %arg16: memref<5x1x32xf32, #tpu.memory_space<vmem>>, %arg17: memref<8x8xf32, #tpu.memory_space<vmem>>, %arg18: memref<1x8xf32, #tpu.memory_space<vmem>>, %arg19: memref<1x1x8xf32, #tpu.memory_space<vmem>>, %arg20: memref<1x1x8xf32, #tpu.memory_space<vmem>>, %arg21: memref<1x1x1xf32, #tpu.memory_space<vmem>>) attributes {dimension_semantics = [#tpu.dimension_semantics<parallel>], iteration_bounds = array<i64: 2>, scalar_prefetch = 0 : i64, scratch_operands = 0 : i64, tpu.core_type = #tpu.core_type<tc>, window_params = [{transform_indices = @transform_0, window_bounds = array<i64: 1, 8, 32>}, {transform_indices = @transform_1, window_bounds = array<i64: 1, 1, 8>}, {pipeline_mode = #tpu.pipeline_mode<synchronous>, transform_indices = @transform_2, window_bounds = array<i64: 5, 8, 8, 8>}, {pipeline_mode = #tpu.pipeline_mode<synchronous>, transform_indices = @transform_3, window_bounds = array<i64: 5, 8, 8, 8>}, {pipeline_mode = #tpu.pipeline_mode<synchronous>, transform_indices = @transform_4, window_bounds = array<i64: 5, 32, 96>}, {pipeline_mode = #tpu.pipeline_mode<synchronous>, transform_indices = @transform_5, window_bounds = array<i64: 5, 1, 96>}, {pipeline_mode = #tpu.pipeline_mode<synchronous>, transform_indices = @transform_6, window_bounds = array<i64: 5, 32, 32>}, {pipeline_mode = #tpu.pipeline_mode<synchronous>, transform_indices = @transform_7, window_bounds = array<i64: 5, 1, 32>}, {pipeline_mode = #tpu.pipeline_mode<synchronous>, transform_indices = @transform_8, window_bounds = array<i64: 5, 1, 32>}, {pipeline_mode = #tpu.pipeline_mode<synchronous>, transform_indices = @transform_9, window_bounds = array<i64: 5, 1, 32>}, {pipeline_mode = #tpu.pipeline_mode<synchronous>, transform_indices = @transform_10, window_bounds = array<i64: 5, 32, 64>}, {pipeline_mode = #tpu.pipeline_mode<synchronous>, transform_indices = @transform_11, window_bounds = array<i64: 5, 1, 64>}, {pipeline_mode = #tpu.pipeline_mode<synchronous>, transform_indices = @transform_12, window_bounds = array<i64: 5, 64, 32>}, {pipeline_mode = #tpu.pipeline_mode<synchronous>, transform_indices = @transform_13, window_bounds = array<i64: 5, 1, 32>}, {pipeline_mode = #tpu.pipeline_mode<synchronous>, transform_indices = @transform_14, window_bounds = array<i64: 5, 1, 32>}, {pipeline_mode = #tpu.pipeline_mode<synchronous>, transform_indices = @transform_15, window_bounds = array<i64: 5, 1, 32>}, {pipeline_mode = #tpu.pipeline_mode<synchronous>, transform_indices = @transform_16, window_bounds = array<i64: 8, 8>}, {pipeline_mode = #tpu.pipeline_mode<synchronous>, transform_indices = @transform_17, window_bounds = array<i64: 1, 8>}, {transform_indices = @transform_18, window_bounds = array<i64: 1, 1, 8>}, {transform_indices = @transform_19, window_bounds = array<i64: 1, 1, 8>}, {transform_indices = @transform_20, window_bounds = array<i64: 1, 1, 1>}]} {
    %c0 = arith.constant 0 : index
    %c0_0 = arith.constant 0 : index
    %c0_1 = arith.constant 0 : index
    %0 = vector.load %arg1[%c0, %c0_0, %c0_1] : memref<1x8x32xf32, #tpu.memory_space<vmem>>, vector<1x8x32xf32>
    %1 = vector.shape_cast %0 : vector<1x8x32xf32> to vector<8x32xf32>
    %c0_2 = arith.constant 0 : index
    %c0_3 = arith.constant 0 : index
    %c0_4 = arith.constant 0 : index
    %2 = vector.load %arg2[%c0_2, %c0_3, %c0_4] : memref<1x1x8xf32, #tpu.memory_space<vmem>>, vector<1x1x8xf32>
    %cst = arith.constant 0.353553385 : f32
    %c0_i32 = arith.constant 0 : i32
    %c5_i32 = arith.constant 5 : i32
    %3 = arith.addi %c0_i32, %c5_i32 : i32
    %c1_i32 = arith.constant 1 : i32
    %4 = scf.for %arg22 = %c0_i32 to %3 step %c1_i32 iter_args(%arg23 = %1) -> (vector<8x32xf32>)  : i32 {
      %28 = arith.truncf %arg23 : vector<8x32xf32> to vector<8x32xbf16>
      %29 = arith.index_cast %arg22 : i32 to index
      %c0_23 = arith.constant 0 : index
      %c0_24 = arith.constant 0 : index
      %30 = vector.load %arg5[%29, %c0_23, %c0_24] : memref<5x32x96xbf16, #tpu.memory_space<vmem>>, vector<1x32x96xbf16>
      %31 = vector.shape_cast %30 : vector<1x32x96xbf16> to vector<32x96xbf16>
      %cst_25 = arith.constant dense<0.000000e+00> : vector<8x96xf32>
      %32 = tpu.matmul %28, %31, %cst_25 {dimension_numbers = #tpu.dot_dimension_numbers<[1], [0], [0], [1], [0, 0, 1, 1], [], []>} : vector<8x32xbf16>, vector<32x96xbf16>, vector<8x96xf32> -> vector<8x96xf32>
      %33 = arith.index_cast %arg22 : i32 to index
      %c0_26 = arith.constant 0 : index
      %c0_27 = arith.constant 0 : index
      %34 = vector.load %arg6[%33, %c0_26, %c0_27] : memref<5x1x96xf32, #tpu.memory_space<vmem>>, vector<1x1x96xf32>
      %35 = vector.shape_cast %34 : vector<1x1x96xf32> to vector<1x96xf32>
      %36 = vector.broadcast %35 : vector<1x96xf32> to vector<8x96xf32>
      %37 = arith.addf %32, %36 : vector<8x96xf32>
      %38 = arith.index_cast %arg22 : i32 to index
      %c0_28 = arith.constant 0 : index
      %c0_29 = arith.constant 0 : index
      %c0_30 = arith.constant 0 : index
      %39 = vector.load %arg3[%38, %c0_28, %c0_29, %c0_30] : memref<5x8x8x8xbf16, #tpu.memory_space<vmem>>, vector<1x8x8x8xbf16>
      %40 = vector.shape_cast %39 : vector<1x8x8x8xbf16> to vector<8x8x8xbf16>
      %41 = arith.index_cast %arg22 : i32 to index
      %c0_31 = arith.constant 0 : index
      %c0_32 = arith.constant 0 : index
      %c0_33 = arith.constant 0 : index
      %42 = vector.load %arg4[%41, %c0_31, %c0_32, %c0_33] : memref<5x8x8x8xbf16, #tpu.memory_space<vmem>>, vector<1x8x8x8xbf16>
      %43 = vector.shape_cast %42 : vector<1x8x8x8xbf16> to vector<8x8x8xbf16>
      %44 = vector.extract_strided_slice %37 {offsets = [0, 0], sizes = [8, 8], strides = [1, 1]} : vector<8x96xf32> to vector<8x8xf32>
      %45 = vector.extract_strided_slice %37 {offsets = [0, 8], sizes = [8, 8], strides = [1, 1]} : vector<8x96xf32> to vector<8x8xf32>
      %46 = vector.extract_strided_slice %37 {offsets = [0, 16], sizes = [8, 8], strides = [1, 1]} : vector<8x96xf32> to vector<8x8xf32>
      %47 = vector.extract_strided_slice %37 {offsets = [0, 24], sizes = [8, 8], strides = [1, 1]} : vector<8x96xf32> to vector<8x8xf32>
      %48 = vector.extract_strided_slice %37 {offsets = [0, 32], sizes = [8, 8], strides = [1, 1]} : vector<8x96xf32> to vector<8x8xf32>
      %49 = vector.extract_strided_slice %37 {offsets = [0, 40], sizes = [8, 8], strides = [1, 1]} : vector<8x96xf32> to vector<8x8xf32>
      %50 = vector.extract_strided_slice %37 {offsets = [0, 48], sizes = [8, 8], strides = [1, 1]} : vector<8x96xf32> to vector<8x8xf32>
      %51 = vector.extract_strided_slice %37 {offsets = [0, 56], sizes = [8, 8], strides = [1, 1]} : vector<8x96xf32> to vector<8x8xf32>
      %52 = vector.extract_strided_slice %37 {offsets = [0, 64], sizes = [8, 8], strides = [1, 1]} : vector<8x96xf32> to vector<8x8xf32>
      %53 = vector.extract_strided_slice %37 {offsets = [0, 72], sizes = [8, 8], strides = [1, 1]} : vector<8x96xf32> to vector<8x8xf32>
      %54 = vector.extract_strided_slice %37 {offsets = [0, 80], sizes = [8, 8], strides = [1, 1]} : vector<8x96xf32> to vector<8x8xf32>
      %55 = vector.extract_strided_slice %37 {offsets = [0, 88], sizes = [8, 8], strides = [1, 1]} : vector<8x96xf32> to vector<8x8xf32>
      %56 = vector.shape_cast %44 : vector<8x8xf32> to vector<8x1x8xf32>
      %57 = vector.shape_cast %45 : vector<8x8xf32> to vector<8x1x8xf32>
      %58 = vector.shape_cast %46 : vector<8x8xf32> to vector<8x1x8xf32>
      %59 = vector.shape_cast %47 : vector<8x8xf32> to vector<8x1x8xf32>
      %60 = tpu.concatenate %56, %57, %58, %59 in 1 : vector<8x1x8xf32>, vector<8x1x8xf32>, vector<8x1x8xf32>, vector<8x1x8xf32> -> vector<8x4x8xf32>
      %61 = arith.truncf %60 : vector<8x4x8xf32> to vector<8x4x8xbf16>
      "tpu.trace_start"() <{level = 10 : i32, message = "ihd,ijd->ihj"}> : () -> ()
      %cst_34 = arith.constant dense<0.000000e+00> : vector<8x4x8xf32>
      %62 = tpu.matmul %61, %40, %cst_34 {dimension_numbers = #tpu.dot_dimension_numbers<[2], [2], [1], [1], [0, 0, 0, 1, 1, 1], [0], [0]>} : vector<8x4x8xbf16>, vector<8x8x8xbf16>, vector<8x4x8xf32> -> vector<8x4x8xf32>
      "tpu.trace_stop"() : () -> ()
      %63 = arith.truncf %44 : vector<8x8xf32> to vector<8x8xbf16>
      %64 = arith.truncf %48 : vector<8x8xf32> to vector<8x8xbf16>
      "tpu.trace_start"() <{level = 10 : i32, message = "id,jd->ij"}> : () -> ()
      %cst_35 = arith.constant dense<0.000000e+00> : vector<8x8xf32>
      %65 = tpu.matmul %63, %64, %cst_35 {dimension_numbers = #tpu.dot_dimension_numbers<[1], [1], [0], [0], [0, 0, 1, 0], [], []>} : vector<8x8xbf16>, vector<8x8xbf16>, vector<8x8xf32> -> vector<8x8xf32>
      "tpu.trace_stop"() : () -> ()
      %66 = arith.truncf %45 : vector<8x8xf32> to vector<8x8xbf16>
      %67 = arith.truncf %49 : vector<8x8xf32> to vector<8x8xbf16>
      "tpu.trace_start"() <{level = 10 : i32, message = "id,jd->ij"}> : () -> ()
      %cst_36 = arith.constant dense<0.000000e+00> : vector<8x8xf32>
      %68 = tpu.matmul %66, %67, %cst_36 {dimension_numbers = #tpu.dot_dimension_numbers<[1], [1], [0], [0], [0, 0, 1, 0], [], []>} : vector<8x8xbf16>, vector<8x8xbf16>, vector<8x8xf32> -> vector<8x8xf32>
      "tpu.trace_stop"() : () -> ()
      %69 = arith.truncf %46 : vector<8x8xf32> to vector<8x8xbf16>
      %70 = arith.truncf %50 : vector<8x8xf32> to vector<8x8xbf16>
      "tpu.trace_start"() <{level = 10 : i32, message = "id,jd->ij"}> : () -> ()
      %cst_37 = arith.constant dense<0.000000e+00> : vector<8x8xf32>
      %71 = tpu.matmul %69, %70, %cst_37 {dimension_numbers = #tpu.dot_dimension_numbers<[1], [1], [0], [0], [0, 0, 1, 0], [], []>} : vector<8x8xbf16>, vector<8x8xbf16>, vector<8x8xf32> -> vector<8x8xf32>
      "tpu.trace_stop"() : () -> ()
      %72 = arith.truncf %47 : vector<8x8xf32> to vector<8x8xbf16>
      %73 = arith.truncf %51 : vector<8x8xf32> to vector<8x8xbf16>
      "tpu.trace_start"() <{level = 10 : i32, message = "id,jd->ij"}> : () -> ()
      %cst_38 = arith.constant dense<0.000000e+00> : vector<8x8xf32>
      %74 = tpu.matmul %72, %73, %cst_38 {dimension_numbers = #tpu.dot_dimension_numbers<[1], [1], [0], [0], [0, 0, 1, 0], [], []>} : vector<8x8xbf16>, vector<8x8xbf16>, vector<8x8xf32> -> vector<8x8xf32>
      "tpu.trace_stop"() : () -> ()
      %75 = vector.shape_cast %65 : vector<8x8xf32> to vector<8x1x8xf32>
      %76 = vector.shape_cast %68 : vector<8x8xf32> to vector<8x1x8xf32>
      %77 = vector.shape_cast %71 : vector<8x8xf32> to vector<8x1x8xf32>
      %78 = vector.shape_cast %74 : vector<8x8xf32> to vector<8x1x8xf32>
      %79 = tpu.concatenate %75, %76, %77, %78 in 1 : vector<8x1x8xf32>, vector<8x1x8xf32>, vector<8x1x8xf32>, vector<8x1x8xf32> -> vector<8x4x8xf32>
      %80 = arith.addf %79, %62 : vector<8x4x8xf32>
      %81 = vector.broadcast %cst : f32 to vector<8x4x8xf32>
      %82 = arith.mulf %80, %81 : vector<8x4x8xf32>
      %83 = vector.broadcast %2 : vector<1x1x8xf32> to vector<8x4x8xf32>
      %84 = arith.addf %82, %83 : vector<8x4x8xf32>
      %cst_39 = arith.constant dense<0xFF800000> : vector<8x4xf32>
      %85 = vector.multi_reduction <maximumf>, %84, %cst_39 [2] : vector<8x4x8xf32> to vector<8x4xf32>
      %86 = vector.shape_cast %85 : vector<8x4xf32> to vector<8x4x1xf32>
      %87 = vector.broadcast %86 : vector<8x4x1xf32> to vector<8x4x8xf32>
      %88 = arith.subf %84, %87 : vector<8x4x8xf32>
      %89 = math.exp %88 : vector<8x4x8xf32>
      %cst_40 = arith.constant dense<0.000000e+00> : vector<8x4xf32>
      %90 = vector.multi_reduction <add>, %89, %cst_40 [2] : vector<8x4x8xf32> to vector<8x4xf32>
      %91 = vector.shape_cast %90 : vector<8x4xf32> to vector<8x4x1xf32>
      %92 = tpu.reciprocal %91 {approx = true} : vector<8x4x1xf32> -> vector<8x4x1xf32>
      %93 = vector.broadcast %92 : vector<8x4x1xf32> to vector<8x4x8xf32>
      %94 = arith.mulf %89, %93 : vector<8x4x8xf32>
      %95 = arith.truncf %94 : vector<8x4x8xf32> to vector<8x4x8xbf16>
      "tpu.trace_start"() <{level = 10 : i32, message = "ihj,ijd->ihd"}> : () -> ()
      %cst_41 = arith.constant dense<0.000000e+00> : vector<8x4x8xf32>
      %96 = tpu.matmul %95, %43, %cst_41 {dimension_numbers = #tpu.dot_dimension_numbers<[2], [1], [1], [2], [0, 0, 0, 1, 1, 2], [0], [0]>} : vector<8x4x8xbf16>, vector<8x8x8xbf16>, vector<8x4x8xf32> -> vector<8x4x8xf32>
      "tpu.trace_stop"() : () -> ()
      %97 = vector.extract_strided_slice %95 {offsets = [0, 0, 0], sizes = [8, 1, 8], strides = [1, 1, 1]} : vector<8x4x8xbf16> to vector<8x1x8xbf16>
      %98 = vector.shape_cast %97 : vector<8x1x8xbf16> to vector<8x8xbf16>
      %99 = arith.truncf %52 : vector<8x8xf32> to vector<8x8xbf16>
      %cst_42 = arith.constant dense<0.000000e+00> : vector<8x8xf32>
      %100 = tpu.matmul %98, %99, %cst_42 {dimension_numbers = #tpu.dot_dimension_numbers<[1], [0], [0], [1], [0, 0, 1, 1], [], []>} : vector<8x8xbf16>, vector<8x8xbf16>, vector<8x8xf32> -> vector<8x8xf32>
      %101 = vector.extract_strided_slice %96 {offsets = [0, 0, 0], sizes = [8, 1, 8], strides = [1, 1, 1]} : vector<8x4x8xf32> to vector<8x1x8xf32>
      %102 = vector.shape_cast %101 : vector<8x1x8xf32> to vector<8x8xf32>
      %103 = arith.addf %100, %102 : vector<8x8xf32>
      %104 = vector.extract_strided_slice %95 {offsets = [0, 1, 0], sizes = [8, 1, 8], strides = [1, 1, 1]} : vector<8x4x8xbf16> to vector<8x1x8xbf16>
      %105 = vector.shape_cast %104 : vector<8x1x8xbf16> to vector<8x8xbf16>
      %106 = arith.truncf %53 : vector<8x8xf32> to vector<8x8xbf16>
      %cst_43 = arith.constant dense<0.000000e+00> : vector<8x8xf32>
      %107 = tpu.matmul %105, %106, %cst_43 {dimension_numbers = #tpu.dot_dimension_numbers<[1], [0], [0], [1], [0, 0, 1, 1], [], []>} : vector<8x8xbf16>, vector<8x8xbf16>, vector<8x8xf32> -> vector<8x8xf32>
      %108 = vector.extract_strided_slice %96 {offsets = [0, 1, 0], sizes = [8, 1, 8], strides = [1, 1, 1]} : vector<8x4x8xf32> to vector<8x1x8xf32>
      %109 = vector.shape_cast %108 : vector<8x1x8xf32> to vector<8x8xf32>
      %110 = arith.addf %107, %109 : vector<8x8xf32>
      %111 = vector.extract_strided_slice %95 {offsets = [0, 2, 0], sizes = [8, 1, 8], strides = [1, 1, 1]} : vector<8x4x8xbf16> to vector<8x1x8xbf16>
      %112 = vector.shape_cast %111 : vector<8x1x8xbf16> to vector<8x8xbf16>
      %113 = arith.truncf %54 : vector<8x8xf32> to vector<8x8xbf16>
      %cst_44 = arith.constant dense<0.000000e+00> : vector<8x8xf32>
      %114 = tpu.matmul %112, %113, %cst_44 {dimension_numbers = #tpu.dot_dimension_numbers<[1], [0], [0], [1], [0, 0, 1, 1], [], []>} : vector<8x8xbf16>, vector<8x8xbf16>, vector<8x8xf32> -> vector<8x8xf32>
      %115 = vector.extract_strided_slice %96 {offsets = [0, 2, 0], sizes = [8, 1, 8], strides = [1, 1, 1]} : vector<8x4x8xf32> to vector<8x1x8xf32>
      %116 = vector.shape_cast %115 : vector<8x1x8xf32> to vector<8x8xf32>
      %117 = arith.addf %114, %116 : vector<8x8xf32>
      %118 = vector.extract_strided_slice %95 {offsets = [0, 3, 0], sizes = [8, 1, 8], strides = [1, 1, 1]} : vector<8x4x8xbf16> to vector<8x1x8xbf16>
      %119 = vector.shape_cast %118 : vector<8x1x8xbf16> to vector<8x8xbf16>
      %120 = arith.truncf %55 : vector<8x8xf32> to vector<8x8xbf16>
      %cst_45 = arith.constant dense<0.000000e+00> : vector<8x8xf32>
      %121 = tpu.matmul %119, %120, %cst_45 {dimension_numbers = #tpu.dot_dimension_numbers<[1], [0], [0], [1], [0, 0, 1, 1], [], []>} : vector<8x8xbf16>, vector<8x8xbf16>, vector<8x8xf32> -> vector<8x8xf32>
      %122 = vector.extract_strided_slice %96 {offsets = [0, 3, 0], sizes = [8, 1, 8], strides = [1, 1, 1]} : vector<8x4x8xf32> to vector<8x1x8xf32>
      %123 = vector.shape_cast %122 : vector<8x1x8xf32> to vector<8x8xf32>
      %124 = arith.addf %121, %123 : vector<8x8xf32>
      %125 = tpu.concatenate %103, %110, %117, %124 in 1 : vector<8x8xf32>, vector<8x8xf32>, vector<8x8xf32>, vector<8x8xf32> -> vector<8x32xf32>
      %126 = arith.truncf %125 : vector<8x32xf32> to vector<8x32xbf16>
      %127 = arith.index_cast %arg22 : i32 to index
      %c0_46 = arith.constant 0 : index
      %c0_47 = arith.constant 0 : index
      %128 = vector.load %arg7[%127, %c0_46, %c0_47] : memref<5x32x32xbf16, #tpu.memory_space<vmem>>, vector<1x32x32xbf16>
      %129 = vector.shape_cast %128 : vector<1x32x32xbf16> to vector<32x32xbf16>
      %cst_48 = arith.constant dense<0.000000e+00> : vector<8x32xf32>
      %130 = tpu.matmul %126, %129, %cst_48 {dimension_numbers = #tpu.dot_dimension_numbers<[1], [0], [0], [1], [0, 0, 1, 1], [], []>} : vector<8x32xbf16>, vector<32x32xbf16>, vector<8x32xf32> -> vector<8x32xf32>
      %131 = arith.index_cast %arg22 : i32 to index
      %c0_49 = arith.constant 0 : index
      %c0_50 = arith.constant 0 : index
      %132 = vector.load %arg8[%131, %c0_49, %c0_50] : memref<5x1x32xf32, #tpu.memory_space<vmem>>, vector<1x1x32xf32>
      %133 = vector.shape_cast %132 : vector<1x1x32xf32> to vector<1x32xf32>
      %134 = vector.broadcast %133 : vector<1x32xf32> to vector<8x32xf32>
      %135 = arith.addf %130, %134 : vector<8x32xf32>
      %136 = arith.addf %arg23, %135 : vector<8x32xf32>
      %137 = arith.index_cast %arg22 : i32 to index
      %c0_51 = arith.constant 0 : index
      %c0_52 = arith.constant 0 : index
      %138 = vector.load %arg9[%137, %c0_51, %c0_52] : memref<5x1x32xf32, #tpu.memory_space<vmem>>, vector<1x1x32xf32>
      %139 = vector.shape_cast %138 : vector<1x1x32xf32> to vector<1x32xf32>
      %140 = arith.index_cast %arg22 : i32 to index
      %c0_53 = arith.constant 0 : index
      %c0_54 = arith.constant 0 : index
      %141 = vector.load %arg10[%140, %c0_53, %c0_54] : memref<5x1x32xf32, #tpu.memory_space<vmem>>, vector<1x1x32xf32>
      %142 = vector.shape_cast %141 : vector<1x1x32xf32> to vector<1x32xf32>
      %cst_55 = arith.constant dense<0.000000e+00> : vector<8xf32>
      %143 = vector.multi_reduction <add>, %136, %cst_55 [1] : vector<8x32xf32> to vector<8xf32>
      %144 = vector.shape_cast %143 : vector<8xf32> to vector<8x1xf32>
      %cst_56 = arith.constant 3.200000e+01 : f32
      %145 = vector.broadcast %cst_56 : f32 to vector<8x1xf32>
      %146 = arith.divf %144, %145 : vector<8x1xf32>
      %147 = vector.broadcast %146 : vector<8x1xf32> to vector<8x32xf32>
      %148 = arith.subf %136, %147 : vector<8x32xf32>
      %149 = arith.mulf %148, %148 : vector<8x32xf32>
      %cst_57 = arith.constant dense<0.000000e+00> : vector<8xf32>
      %150 = vector.multi_reduction <add>, %149, %cst_57 [1] : vector<8x32xf32> to vector<8xf32>
      %151 = vector.shape_cast %150 : vector<8xf32> to vector<8x1xf32>
      %cst_58 = arith.constant 3.200000e+01 : f32
      %152 = vector.broadcast %cst_58 : f32 to vector<8x1xf32>
      %153 = arith.divf %151, %152 : vector<8x1xf32>
      %154 = vector.broadcast %146 : vector<8x1xf32> to vector<8x32xf32>
      %155 = arith.subf %136, %154 : vector<8x32xf32>
      %cst_59 = arith.constant 9.99999974E-6 : f32
      %156 = vector.broadcast %cst_59 : f32 to vector<8x1xf32>
      %157 = arith.addf %153, %156 : vector<8x1xf32>
      %158 = math.rsqrt %157 : vector<8x1xf32>
      %159 = vector.broadcast %158 : vector<8x1xf32> to vector<8x32xf32>
      %160 = arith.mulf %155, %159 : vector<8x32xf32>
      %161 = vector.broadcast %139 : vector<1x32xf32> to vector<8x32xf32>
      %162 = arith.mulf %160, %161 : vector<8x32xf32>
      %163 = vector.broadcast %142 : vector<1x32xf32> to vector<8x32xf32>
      %164 = arith.addf %162, %163 : vector<8x32xf32>
      %165 = arith.truncf %164 : vector<8x32xf32> to vector<8x32xbf16>
      %166 = arith.index_cast %arg22 : i32 to index
      %c0_60 = arith.constant 0 : index
      %c0_61 = arith.constant 0 : index
      %167 = vector.load %arg11[%166, %c0_60, %c0_61] : memref<5x32x64xbf16, #tpu.memory_space<vmem>>, vector<1x32x64xbf16>
      %168 = vector.shape_cast %167 : vector<1x32x64xbf16> to vector<32x64xbf16>
      %cst_62 = arith.constant dense<0.000000e+00> : vector<8x64xf32>
      %169 = tpu.matmul %165, %168, %cst_62 {dimension_numbers = #tpu.dot_dimension_numbers<[1], [0], [0], [1], [0, 0, 1, 1], [], []>} : vector<8x32xbf16>, vector<32x64xbf16>, vector<8x64xf32> -> vector<8x64xf32>
      %170 = arith.index_cast %arg22 : i32 to index
      %c0_63 = arith.constant 0 : index
      %c0_64 = arith.constant 0 : index
      %171 = vector.load %arg12[%170, %c0_63, %c0_64] : memref<5x1x64xf32, #tpu.memory_space<vmem>>, vector<1x1x64xf32>
      %172 = vector.shape_cast %171 : vector<1x1x64xf32> to vector<1x64xf32>
      %173 = vector.broadcast %172 : vector<1x64xf32> to vector<8x64xf32>
      %174 = arith.addf %169, %173 : vector<8x64xf32>
      %cst_65 = arith.constant 5.000000e-01 : f32
      %175 = vector.broadcast %cst_65 : f32 to vector<8x64xf32>
      %176 = arith.mulf %175, %174 : vector<8x64xf32>
      %cst_66 = arith.constant 4.471500e-02 : f32
      %177 = vector.broadcast %cst_66 : f32 to vector<8x64xf32>
      %178 = arith.mulf %177, %174 : vector<8x64xf32>
      %179 = arith.mulf %178, %174 : vector<8x64xf32>
      %180 = arith.mulf %179, %174 : vector<8x64xf32>
      %181 = arith.addf %174, %180 : vector<8x64xf32>
      %cst_67 = arith.constant 0.797884583 : f32
      %182 = vector.broadcast %cst_67 : f32 to vector<8x64xf32>
      %183 = arith.mulf %182, %181 : vector<8x64xf32>
      %184 = math.tanh %183 : vector<8x64xf32>
      %cst_68 = arith.constant 1.000000e+00 : f32
      %185 = vector.broadcast %cst_68 : f32 to vector<8x64xf32>
      %186 = arith.addf %185, %184 : vector<8x64xf32>
      %187 = arith.mulf %176, %186 : vector<8x64xf32>
      %188 = arith.truncf %187 : vector<8x64xf32> to vector<8x64xbf16>
      %189 = arith.index_cast %arg22 : i32 to index
      %c0_69 = arith.constant 0 : index
      %c0_70 = arith.constant 0 : index
      %190 = vector.load %arg13[%189, %c0_69, %c0_70] : memref<5x64x32xbf16, #tpu.memory_space<vmem>>, vector<1x64x32xbf16>
      %191 = vector.shape_cast %190 : vector<1x64x32xbf16> to vector<64x32xbf16>
      %cst_71 = arith.constant dense<0.000000e+00> : vector<8x32xf32>
      %192 = tpu.matmul %188, %191, %cst_71 {dimension_numbers = #tpu.dot_dimension_numbers<[1], [0], [0], [1], [0, 0, 1, 1], [], []>} : vector<8x64xbf16>, vector<64x32xbf16>, vector<8x32xf32> -> vector<8x32xf32>
      %193 = arith.index_cast %arg22 : i32 to index
      %c0_72 = arith.constant 0 : index
      %c0_73 = arith.constant 0 : index
      %194 = vector.load %arg14[%193, %c0_72, %c0_73] : memref<5x1x32xf32, #tpu.memory_space<vmem>>, vector<1x1x32xf32>
      %195 = vector.shape_cast %194 : vector<1x1x32xf32> to vector<1x32xf32>
      %196 = vector.broadcast %195 : vector<1x32xf32> to vector<8x32xf32>
      %197 = arith.addf %192, %196 : vector<8x32xf32>
      %198 = arith.addf %164, %197 : vector<8x32xf32>
      %199 = arith.index_cast %arg22 : i32 to index
      %c0_74 = arith.constant 0 : index
      %c0_75 = arith.constant 0 : index
      %200 = vector.load %arg15[%199, %c0_74, %c0_75] : memref<5x1x32xf32, #tpu.memory_space<vmem>>, vector<1x1x32xf32>
      %201 = vector.shape_cast %200 : vector<1x1x32xf32> to vector<1x32xf32>
      %202 = arith.index_cast %arg22 : i32 to index
      %c0_76 = arith.constant 0 : index
      %c0_77 = arith.constant 0 : index
      %203 = vector.load %arg16[%202, %c0_76, %c0_77] : memref<5x1x32xf32, #tpu.memory_space<vmem>>, vector<1x1x32xf32>
      %204 = vector.shape_cast %203 : vector<1x1x32xf32> to vector<1x32xf32>
      %cst_78 = arith.constant dense<0.000000e+00> : vector<8xf32>
      %205 = vector.multi_reduction <add>, %198, %cst_78 [1] : vector<8x32xf32> to vector<8xf32>
      %206 = vector.shape_cast %205 : vector<8xf32> to vector<8x1xf32>
      %cst_79 = arith.constant 3.200000e+01 : f32
      %207 = vector.broadcast %cst_79 : f32 to vector<8x1xf32>
      %208 = arith.divf %206, %207 : vector<8x1xf32>
      %209 = vector.broadcast %208 : vector<8x1xf32> to vector<8x32xf32>
      %210 = arith.subf %198, %209 : vector<8x32xf32>
      %211 = arith.mulf %210, %210 : vector<8x32xf32>
      %cst_80 = arith.constant dense<0.000000e+00> : vector<8xf32>
      %212 = vector.multi_reduction <add>, %211, %cst_80 [1] : vector<8x32xf32> to vector<8xf32>
      %213 = vector.shape_cast %212 : vector<8xf32> to vector<8x1xf32>
      %cst_81 = arith.constant 3.200000e+01 : f32
      %214 = vector.broadcast %cst_81 : f32 to vector<8x1xf32>
      %215 = arith.divf %213, %214 : vector<8x1xf32>
      %216 = vector.broadcast %208 : vector<8x1xf32> to vector<8x32xf32>
      %217 = arith.subf %198, %216 : vector<8x32xf32>
      %cst_82 = arith.constant 9.99999974E-6 : f32
      %218 = vector.broadcast %cst_82 : f32 to vector<8x1xf32>
      %219 = arith.addf %215, %218 : vector<8x1xf32>
      %220 = math.rsqrt %219 : vector<8x1xf32>
      %221 = vector.broadcast %220 : vector<8x1xf32> to vector<8x32xf32>
      %222 = arith.mulf %217, %221 : vector<8x32xf32>
      %223 = vector.broadcast %201 : vector<1x32xf32> to vector<8x32xf32>
      %224 = arith.mulf %222, %223 : vector<8x32xf32>
      %225 = vector.broadcast %204 : vector<1x32xf32> to vector<8x32xf32>
      %226 = arith.addf %224, %225 : vector<8x32xf32>
      scf.yield %226 : vector<8x32xf32>
    }
    %c5_i32_5 = arith.constant 5 : i32
    %cst_6 = arith.constant dense<0.000000e+00> : vector<8xf32>
    %5 = vector.multi_reduction <add>, %4, %cst_6 [1] : vector<8x32xf32> to vector<8xf32>
    %6 = vector.shape_cast %5 : vector<8xf32> to vector<8x1xf32>
    %cst_7 = arith.constant 3.125000e-02 : f32
    %7 = vector.broadcast %cst_7 : f32 to vector<8x1xf32>
    %8 = arith.mulf %6, %7 : vector<8x1xf32>
    %c0_8 = arith.constant 0 : index
    %c0_9 = arith.constant 0 : index
    %9 = vector.load %arg17[%c0_8, %c0_9] : memref<8x8xf32, #tpu.memory_space<vmem>>, vector<8x8xf32>
    %10 = vector.broadcast %8 : vector<8x1xf32> to vector<8x8xf32>
    %11 = arith.mulf %10, %9 : vector<8x8xf32>
    %cst_10 = arith.constant dense<0.000000e+00> : vector<8xf32>
    %12 = vector.multi_reduction <add>, %11, %cst_10 [0] : vector<8x8xf32> to vector<8xf32>
    %13 = vector.shape_cast %12 : vector<8xf32> to vector<1x8xf32>
    %c0_11 = arith.constant 0 : index
    %c0_12 = arith.constant 0 : index
    %14 = vector.load %arg18[%c0_11, %c0_12] : memref<1x8xf32, #tpu.memory_space<vmem>>, vector<1x8xf32>
    %15 = arith.addf %13, %14 : vector<1x8xf32>
    %c0_13 = arith.constant 0 : index
    %c0_14 = arith.constant 0 : index
    %c0_15 = arith.constant 0 : index
    %16 = vector.load %arg20[%c0_13, %c0_14, %c0_15] : memref<1x1x8xf32, #tpu.memory_space<vmem>>, vector<1x1x8xf32>
    %17 = vector.shape_cast %16 : vector<1x1x8xf32> to vector<1x8xf32>
    %18 = vector.shape_cast %15 : vector<1x8xf32> to vector<1x1x8xf32>
    tpu.vector_store %arg20[%c0_13, %c0_14, %c0_15], %18 {strides = array<i32>} : memref<1x1x8xf32, #tpu.memory_space<vmem>>, vector<1x1x8xf32>,
    %c0_16 = arith.constant 0 : index
    %c0_17 = arith.constant 0 : index
    %c0_18 = arith.constant 0 : index
    %19 = vector.load %arg19[%c0_16, %c0_17, %c0_18] : memref<1x1x8xf32, #tpu.memory_space<vmem>>, vector<1x1x8xf32>
    %20 = vector.shape_cast %19 : vector<1x1x8xf32> to vector<1x8xf32>
    %21 = arith.subf %15, %20 : vector<1x8xf32>
    %22 = arith.mulf %21, %21 : vector<1x8xf32>
    %cst_19 = arith.constant dense<0.000000e+00> : vector<1xf32>
    %23 = vector.multi_reduction <add>, %22, %cst_19 [1] : vector<1x8xf32> to vector<1xf32>
    %24 = vector.shape_cast %23 : vector<1xf32> to vector<1x1xf32>
    %c0_20 = arith.constant 0 : index
    %c0_21 = arith.constant 0 : index
    %c0_22 = arith.constant 0 : index
    %25 = vector.load %arg21[%c0_20, %c0_21, %c0_22] : memref<1x1x1xf32, #tpu.memory_space<vmem>>, vector<1x1x1xf32>
    %26 = vector.shape_cast %25 : vector<1x1x1xf32> to vector<1x1xf32>
    %27 = vector.shape_cast %24 : vector<1x1xf32> to vector<1x1x1xf32>
    tpu.vector_store %arg21[%c0_20, %c0_21, %c0_22], %27 {strides = array<i32>} : memref<1x1x1xf32, #tpu.memory_space<vmem>>, vector<1x1x1xf32>,
    return
  }
  func.func @transform_0(%arg0: i32) -> (i32, i32, i32) {
    %c0_i32 = arith.constant 0 : i32
    %c0_i32_0 = arith.constant 0 : i32
    %c0_i32_1 = arith.constant 0 : i32
    return %arg0, %c0_i32, %c0_i32_0 : i32, i32, i32
  }
  func.func @transform_1(%arg0: i32) -> (i32, i32, i32) {
    %c0_i32 = arith.constant 0 : i32
    %c0_i32_0 = arith.constant 0 : i32
    %c0_i32_1 = arith.constant 0 : i32
    return %arg0, %c0_i32, %c0_i32_0 : i32, i32, i32
  }
  func.func @transform_2(%arg0: i32) -> (i32, i32, i32, i32) {
    %c0_i32 = arith.constant 0 : i32
    %c0_i32_0 = arith.constant 0 : i32
    %c0_i32_1 = arith.constant 0 : i32
    %c0_i32_2 = arith.constant 0 : i32
    %c0_i32_3 = arith.constant 0 : i32
    return %c0_i32, %c0_i32_0, %c0_i32_1, %c0_i32_2 : i32, i32, i32, i32
  }
  func.func @transform_3(%arg0: i32) -> (i32, i32, i32, i32) {
    %c0_i32 = arith.constant 0 : i32
    %c0_i32_0 = arith.constant 0 : i32
    %c0_i32_1 = arith.constant 0 : i32
    %c0_i32_2 = arith.constant 0 : i32
    %c0_i32_3 = arith.constant 0 : i32
    return %c0_i32, %c0_i32_0, %c0_i32_1, %c0_i32_2 : i32, i32, i32, i32
  }
  func.func @transform_4(%arg0: i32) -> (i32, i32, i32) {
    %c0_i32 = arith.constant 0 : i32
    %c0_i32_0 = arith.constant 0 : i32
    %c0_i32_1 = arith.constant 0 : i32
    %c0_i32_2 = arith.constant 0 : i32
    return %c0_i32, %c0_i32_0, %c0_i32_1 : i32, i32, i32
  }
  func.func @transform_5(%arg0: i32) -> (i32, i32, i32) {
    %c0_i32 = arith.constant 0 : i32
    %c0_i32_0 = arith.constant 0 : i32
    %c0_i32_1 = arith.constant 0 : i32
    %c0_i32_2 = arith.constant 0 : i32
    return %c0_i32, %c0_i32_0, %c0_i32_1 : i32, i32, i32
  }
  func.func @transform_6(%arg0: i32) -> (i32, i32, i32) {
    %c0_i32 = arith.constant 0 : i32
    %c0_i32_0 = arith.constant 0 : i32
    %c0_i32_1 = arith.constant 0 : i32
    %c0_i32_2 = arith.constant 0 : i32
    return %c0_i32, %c0_i32_0, %c0_i32_1 : i32, i32, i32
  }
  func.func @transform_7(%arg0: i32) -> (i32, i32, i32) {
    %c0_i32 = arith.constant 0 : i32
    %c0_i32_0 = arith.constant 0 : i32
    %c0_i32_1 = arith.constant 0 : i32
    %c0_i32_2 = arith.constant 0 : i32
    return %c0_i32, %c0_i32_0, %c0_i32_1 : i32, i32, i32
  }
  func.func @transform_8(%arg0: i32) -> (i32, i32, i32) {
    %c0_i32 = arith.constant 0 : i32
    %c0_i32_0 = arith.constant 0 : i32
    %c0_i32_1 = arith.constant 0 : i32
    %c0_i32_2 = arith.constant 0 : i32
    return %c0_i32, %c0_i32_0, %c0_i32_1 : i32, i32, i32
  }
  func.func @transform_9(%arg0: i32) -> (i32, i32, i32) {
    %c0_i32 = arith.constant 0 : i32
    %c0_i32_0 = arith.constant 0 : i32
    %c0_i32_1 = arith.constant 0 : i32
    %c0_i32_2 = arith.constant 0 : i32
    return %c0_i32, %c0_i32_0, %c0_i32_1 : i32, i32, i32
  }
  func.func @transform_10(%arg0: i32) -> (i32, i32, i32) {
    %c0_i32 = arith.constant 0 : i32
    %c0_i32_0 = arith.constant 0 : i32
    %c0_i32_1 = arith.constant 0 : i32
    %c0_i32_2 = arith.constant 0 : i32
    return %c0_i32, %c0_i32_0, %c0_i32_1 : i32, i32, i32
  }
  func.func @transform_11(%arg0: i32) -> (i32, i32, i32) {
    %c0_i32 = arith.constant 0 : i32
    %c0_i32_0 = arith.constant 0 : i32
    %c0_i32_1 = arith.constant 0 : i32
    %c0_i32_2 = arith.constant 0 : i32
    return %c0_i32, %c0_i32_0, %c0_i32_1 : i32, i32, i32
  }
  func.func @transform_12(%arg0: i32) -> (i32, i32, i32) {
    %c0_i32 = arith.constant 0 : i32
    %c0_i32_0 = arith.constant 0 : i32
    %c0_i32_1 = arith.constant 0 : i32
    %c0_i32_2 = arith.constant 0 : i32
    return %c0_i32, %c0_i32_0, %c0_i32_1 : i32, i32, i32
  }
  func.func @transform_13(%arg0: i32) -> (i32, i32, i32) {
    %c0_i32 = arith.constant 0 : i32
    %c0_i32_0 = arith.constant 0 : i32
    %c0_i32_1 = arith.constant 0 : i32
    %c0_i32_2 = arith.constant 0 : i32
    return %c0_i32, %c0_i32_0, %c0_i32_1 : i32, i32, i32
  }
  func.func @transform_14(%arg0: i32) -> (i32, i32, i32) {
    %c0_i32 = arith.constant 0 : i32
    %c0_i32_0 = arith.constant 0 : i32
    %c0_i32_1 = arith.constant 0 : i32
    %c0_i32_2 = arith.constant 0 : i32
    return %c0_i32, %c0_i32_0, %c0_i32_1 : i32, i32, i32
  }
  func.func @transform_15(%arg0: i32) -> (i32, i32, i32) {
    %c0_i32 = arith.constant 0 : i32
    %c0_i32_0 = arith.constant 0 : i32
    %c0_i32_1 = arith.constant 0 : i32
    %c0_i32_2 = arith.constant 0 : i32
    return %c0_i32, %c0_i32_0, %c0_i32_1 : i32, i32, i32
  }
  func.func @transform_16(%arg0: i32) -> (i32, i32) {
    %c0_i32 = arith.constant 0 : i32
    %c0_i32_0 = arith.constant 0 : i32
    %c0_i32_1 = arith.constant 0 : i32
    return %c0_i32, %c0_i32_0 : i32, i32
  }
  func.func @transform_17(%arg0: i32) -> (i32, i32) {
    %c0_i32 = arith.constant 0 : i32
    %c0_i32_0 = arith.constant 0 : i32
    %c0_i32_1 = arith.constant 0 : i32
    return %c0_i32, %c0_i32_0 : i32, i32
  }
  func.func @transform_18(%arg0: i32) -> (i32, i32, i32) {
    %c0_i32 = arith.constant 0 : i32
    %c0_i32_0 = arith.constant 0 : i32
    %c0_i32_1 = arith.constant 0 : i32
    return %arg0, %c0_i32, %c0_i32_0 : i32, i32, i32
  }
  func.func @transform_19(%arg0: i32) -> (i32, i32, i32) {
    %c0_i32 = arith.constant 0 : i32
    %c0_i32_0 = arith.constant 0 : i32
    %c0_i32_1 = arith.constant 0 : i32
    return %arg0, %c0_i32, %c0_i32_0 : i32, i32, i32
  }
  func.func @transform_20(%arg0: i32) -> (i32, i32, i32) {
    %c0_i32 = arith.constant 0 : i32
    %c0_i32_0 = arith.constant 0 : i32
    %c0_i32_1 = arith.constant 0 : i32
    return %arg0, %c0_i32, %c0_i32_0 : i32, i32, i32
  }
}

</mosaic_0001>

<bundles_post_ra>
// kernel: tpu_custom_call.1
= control target key start
LH: loop header
LB: loop body
LE: loop exit
PB: predicated region body
PF: predicated region fallthrough
CT: control target
= control target key end

     0   :  { %s5220_s0 = inlined_call_operand.hbm [shape: f32[2,8,32], index: 0, kind: input, shape index: {}]   ;;  %s5221_s1 = inlined_call_operand.hbm [shape: f32[2,1,8], index: 1, kind: input, shape index: {}]   ;;  %s5222_s2 = inlined_call_operand.vmem [shape: bf16[5,8,8,8], index: 2, kind: input, shape index: {}]   ;;  %s5223_s3 = inlined_call_operand.hbm [shape: bf16[5,8,8,8], index: 3, kind: input, shape index: {}]   ;;  %s5224_s4 = inlined_call_operand.vmem [shape: bf16[5,32,96], index: 4, kind: input, shape index: {}]   ;;  %s5225_s5 = inlined_call_operand.vmem [shape: f32[5,1,96], index: 5, kind: input, shape index: {}]   ;;  %s5226_s6 = inlined_call_operand.hbm [shape: bf16[5,32,32], index: 6, kind: input, shape index: {}]   ;;  %s5227_s7 = inlined_call_operand.vmem [shape: f32[5,1,32], index: 7, kind: input, shape index: {}]   ;;  %s5228_s8 = inlined_call_operand.vmem [shape: f32[5,1,32], index: 8, kind: input, shape index: {}]   ;;  %s5229_s9 = inlined_call_operand.vmem [shape: f32[5,1,32], index: 9, kind: input, shape index: {}]   ;;  %s5230_s10 = inlined_call_operand.hbm [shape: bf16[5,32,64], index: 10, kind: input, shape index: {}]   ;;  %s5231_s11 = inlined_call_operand.vmem [shape: f32[5,1,64], index: 11, kind: input, shape index: {}]   ;;  %s5232_s12 = inlined_call_operand.vmem [shape: bf16[5,64,32], index: 12, kind: input, shape index: {}]   ;;  %s5233_s13 = inlined_call_operand.vmem [shape: f32[5,1,32], index: 13, kind: input, shape index: {}]   ;;  %s5234_s14 = inlined_call_operand.vmem [shape: f32[5,1,32], index: 14, kind: input, shape index: {}]   ;;  %s5235_s15 = inlined_call_operand.vmem [shape: f32[5,1,32], index: 15, kind: input, shape index: {}]   ;;  %s5236_s16 = inlined_call_operand.vmem [shape: f32[8,8], index: 16, kind: input, shape index: {}]   ;;  %s5237_s17 = inlined_call_operand.vmem [shape: f32[1,8], index: 17, kind: input, shape index: {}]   ;;  %s5238_s18 = inlined_call_operand.vmem [shape: f32[2,1,8], index: 18, kind: input, shape index: {}]   ;;  %s5239_s19 = inlined_call_operand.hbm [shape: f32[2,1,8], index: 19, kind: output, shape index: {0}]   ;;  %s5240_s20 = inlined_call_operand.vmem [shape: f32[2,1,1], index: 20, kind: output, shape index: {1}]  }
   0x1   :  { %5252 = sst [smem:[#allocation19_spill]] %s5220_s0 }
   0x2   :  { %5253 = sst [smem:[#allocation20_spill]] %s5221_s1 }
   0x3   :  { %5254 = sst [smem:[#allocation21_spill]] %s5222_s2 }
   0x4   :  { %5255 = sst [smem:[#allocation22_spill]] %s5223_s3 }
   0x5   :  { %5256 = sst [smem:[#allocation23_spill]] %s5224_s4 }
   0x6   :  { %5257 = sst [smem:[#allocation24_spill]] %s5226_s6 }
   0x7   :  { %5258 = sst [smem:[#allocation25_spill]] %s5229_s9 }
   0x8   :  { %5259 = sst [smem:[#allocation26_spill]] %s5230_s10 }
   0x9   :  { %5260 = sst [smem:[#allocation27_spill]] %s5231_s11 }
   0xa   :  { %5261 = sst [smem:[#allocation28_spill]] %s5233_s13 }
   0xb   :  { %5262 = sst [smem:[#allocation29_spill]] %s5234_s14 }
   0xc   :  { %5263 = sst [smem:[#allocation30_spill]] %s5235_s15 }
   0xd   :  { %5264 = sst [smem:[#allocation31_spill]] %s5236_s16 }
   0xe   :  { %5265 = sst [smem:[#allocation32_spill]] %s5237_s17 }
   0xf   :  { %5266 = sst [smem:[#allocation33_spill]] %s5239_s19 }
  0x10   :  { %26 = vsyncpa [#allocation3], 0 }
  0x11   :  { %28 = vsyncpa [#allocation3 + $0x1], 0 }
  0x12   :  { %29 = vsyncpa [#allocation6], 0 }
  0x13   :  { %31 = vsyncpa [#allocation6 + $0x1], 0 }
  0x14   :  { %32 = vsyncpa [#allocation9], 0 }
  0x15   :  { %33 = vsyncpa [#allocation4], 0 }
  0x16   :  { %35 = vsyncpa [#allocation4 + $0x1], 0  ;;  %s4253_s1 = smov 0   ;;  %s4255_s22 = smov 0  }
  0x17   :  { %s4257_s23 = smov 0   ;;  %s4259_s24 = smov 0  }
  0x18 LB: > { %5267 = sst [smem:[#allocation17_spill]] %s4101_s1  ;;  %s4274_s2 = sadd.s32 4294967295, %s4113_s24   ;;  %s4113_s24 = sphi %s4259_s24, %s5313_s24   ;;  %s4109_s23 = sphi %s4257_s23, %s5312_s23   ;;  %s4105_s22 = sphi %s4255_s22, %s5311_s22   ;;  %s4101_s1 = sphi %s4253_s1, %s5310_s1  }
  0x19   : > { %s3338_s25 = sadd.s32 4294967294, %s4113_s24   ;;  %p61_p0 = scmp.ne.s32.totalorder %s4105_s22, %s4101_s1 }
  0x1a   : > { %p5247_p1 = scmp.eq.s32.totalorder %s4274_s2, 0  ;;  %p479_p3 = scmp.eq.s32.totalorder %s3338_s25, 1 }
  0x1b   : > { %p3339_p5 = scmp.ge.s32.totalorder %s4113_s24, 1  ;;  %p512_p7 = scmp.lt.s32.totalorder %s4113_s24, 3 }
  0x1c   : > { %p4283_p4 = por %p5247_p1, %p61_p0  ;;  %p4288_p6 = por %p479_p3, %p61_p0 }
  0x1d   : > { %p4293_p8 = pnand %p3339_p5, %p512_p7  ;;  %s4123_s28 = smov [#allocation7]  }
  0x1e   : > { %s5268_s3 = scalar_select %p4283_p4, 1, 0 }
  0x1f   : > { %s5269_s26 = scalar_select %p4288_p6, 1, 0 }
  0x20   : > { %s5271_s27 = scalar_select %p4293_p8, 1, 0 }
  0x21   : > { %5270 = sst [smem:[#allocation18_spill]] %s5269_s26  ;;  %s527_s4 = sshll.u32 %s4123_s28, 4  ;;  %s4297_s4 = int_to_ptr.vmem [resolvable:$true] %s527_s4 }
  0x22   : > { %p3676_p9 = pneg %p4293_p8  ;;  %s4124_s30 = smov [#allocation8]  }
  0x23   : > { %s546_s0 = sshll.u32 %s4124_s30, 4  ;;  %s4125_s21 = smov [#allocation10]   ;;  %s4308_s0 = int_to_ptr.vmem [resolvable:$true] %s546_s0 }
  0x24   : > { %p4304_p11 = pnand %p3676_p9, %p5247_p1  ;;  %s4310_s25 = sshll.u32 %s4125_s21, 4  ;;  %s569_s25 = int_to_ptr.vmem [resolvable:$true] %s4310_s25 }
  0x25   : > { %s5273_s1 = sld [smem:[#allocation22_spill]] }
  0x26   : > { %p4320_p13 = pneg %p4304_p11 }
  0x2b   : > { %s5274_s19 = smov %s5273_s1  ;;  %s3883_s17 = scalar_lea.hbm %s5273_s1, 2560 }
  0x2c   : > { %p3884_p12 = scmp.ne.s32.totalorder %s5274_s19, %s3883_s17  ;;  %p3890_p5 = scmp.lt.u32.totalorder %s3883_s17, %s5274_s19 }
  0x2e   : > { %p3886_p0 = pnand %p4320_p13, %p3884_p12 }
  0x30   : > { %p3887_p3 = pneg %p3886_p0 }
  0x32   : > { %p3892_p7 = pnand %p3890_p5, %p3887_p3 }
  0x34   : > { %3895 = shalt.err (!%p3892_p7)
}
  0x35   : > { %s3896_s15 = scalar_lea.vmem %s4297_s4, 2560  ;;  %p3904_p2 = scmp.lt.s32.totalorder %s4297_s4, %s4297_s4 }
  0x36   : > { %p3897_p9 = scmp.ne.s32.totalorder %s4297_s4, %s3896_s15  ;;  %p3905_p6 = scmp.lt.s32.totalorder %s3896_s15, %s3896_s15 }
  0x38   : > { %p3899_p10 = pnand %p3897_p9, %p4320_p13  ;;  %p3906_p12 = por %p3905_p6, %p3904_p2 }
  0x3a   : > { %p3900_p1 = pneg %p3899_p10 }
  0x3c   : > { %p3907_p0 = pnand %p3906_p12, %p3900_p1 }
  0x3e   : > { %3910 = shalt.err (!%p3907_p0)
}
  0x3f   : > { %s4126_s16 = smov 64   ;;  %s4127_s17 = smov 4  }
  0x40   : > { %3679 = dma.hbm_to_vmem [thread:$0]  (!%p4304_p11), %s5274_s19, 2560, %s4297_s4, [#allocation6], %s4126_s16, %s4126_s16, %s4127_s17  }
  0x41   : > { %s5276_s6 = sld [smem:[#allocation24_spill]] }
  0x47   : > { %s3911_s21 = scalar_lea.hbm %s5276_s6, 1280 }
  0x48   : > { %p3912_p1 = scmp.ne.s32.totalorder %s5276_s6, %s3911_s21  ;;  %p3918_p10 = scmp.lt.u32.totalorder %s3911_s21, %s5276_s6 }
  0x4a   : > { %p3914_p2 = pnand %p3912_p1, %p4320_p13 }
  0x4c   : > { %p3915_p6 = pneg %p3914_p2 }
  0x4e   : > { %p3920_p3 = pnand %p3918_p10, %p3915_p6 }
  0x50   : > { %3923 = shalt.err (!%p3920_p3)
}
  0x51   : > { %s3924_s4 = scalar_lea.vmem %s4308_s0, 1280  ;;  %p3932_p12 = scmp.lt.s32.totalorder %s4308_s0, %s4308_s0 }
  0x52   : > { %p3925_p5 = scmp.ne.s32.totalorder %s4308_s0, %s3924_s4  ;;  %p3933_p0 = scmp.lt.s32.totalorder %s3924_s4, %s3924_s4 }
  0x54   : > { %p3927_p7 = pnand %p3925_p5, %p4320_p13  ;;  %p3934_p1 = por %p3933_p0, %p3932_p12 }
  0x56   : > { %p3928_p9 = pneg %p3927_p7 }
  0x58   : > { %p3935_p2 = pnand %p3934_p1, %p3928_p9 }
  0x5a   : > { %3938 = shalt.err (!%p3935_p2)
}
  0x5b   : > { %3682 = dma.hbm_to_vmem [thread:$0]  (!%p4304_p11), %s5276_s6, 1280, %s4308_s0, [#allocation9], %s4126_s16, %s4126_s16, %s4127_s17  }
  0x5c   : > { %s5277_s10 = sld [smem:[#allocation26_spill]] }
  0x62   : > { %s3939_s26 = scalar_lea.hbm %s5277_s10, 1280 }
  0x63   : > { %p3940_p6 = scmp.ne.s32.totalorder %s5277_s10, %s3939_s26  ;;  %p3946_p5 = scmp.lt.u32.totalorder %s3939_s26, %s5277_s10 }
  0x65   : > { %p3942_p10 = pnand %p3940_p6, %p4320_p13 }
  0x67   : > { %p3943_p3 = pneg %p3942_p10 }
  0x69   : > { %p3948_p7 = pnand %p3946_p5, %p3943_p3 }
  0x6b   : > { %3951 = shalt.err (!%p3948_p7)
}
  0x6c   : > { %s3952_s4 = scalar_lea.vmem %s569_s25, 1280  ;;  %p3960_p1 = scmp.lt.s32.totalorder %s569_s25, %s569_s25 }
  0x6d   : > { %p3953_p9 = scmp.ne.s32.totalorder %s569_s25, %s3952_s4  ;;  %p3961_p2 = scmp.lt.s32.totalorder %s3952_s4, %s3952_s4 }
  0x6f   : > { %p3955_p12 = pnand %p3953_p9, %p4320_p13  ;;  %p3962_p4 = por %p3961_p2, %p3960_p1 }
  0x71   : > { %p3956_p0 = pneg %p3955_p12 }
  0x73   : > { %p3963_p8 = pnand %p3962_p4, %p3956_p0 }
  0x75   : > { %3966 = shalt.err (!%p3963_p8)
}
  0x76   : > { %3685 = dma.hbm_to_vmem [thread:$0]  (!%p4304_p11), %s5277_s10, 1280, %s569_s25, [#allocation9], %s4126_s16, %s4126_s16, %s4127_s17  }
  0x77   : > { %s4393_s14 = sadd.s32 1, %s4113_s24   ;;  %s48_s11 = sadd.s32 1, %s4109_s23 }
  0x78   : > { %s45_s29 = ssub.s32 %s4113_s24, %s4393_s14  ;;  %p55_p8 = scmp.ne.s32.totalorder %s4109_s23, %s4105_s22 }
  0x79   : > { %p46_p4 = scmp.eq.s32.totalorder %s45_s29, 0  ;;  %p56_p13 = scmp.eq.s32.totalorder %s4113_s24, 0 }
  0x7a   : > { %p3700_p6 = scmp.lt.s32.totalorder %s4113_s24, 2  ;;  %p5278_p3 = scmp.eq.s32.totalorder %s4274_s2, 1 }
  0x7b   : > { %s4403_s13 = scalar_select %p46_p4, %s4109_s23, %s48_s11  }
  0x7c   : > { %p57_p10 = por %p56_p13, %p55_p8  ;;  %p4407_p5 = por %p5278_p3, %p55_p8 }
  0x7d   : > { %s4412_s26 = sand.u32 1, %s4109_s23   ;;  %s3345_s25 = sshll.u32 %s4113_s24, 7 }
  0x7e   : > { %s5279_s1 = scalar_select %p4407_p5, 1, 0 }
  0x7f   : > { %s3344_s16 = sshll.u32 %s4412_s26, 3  ;;  %s5280_s30 = sld [smem:[#allocation19_spill]] }
  0x80   : > { %s607_s15 = scalar_lea.vmem [#allocation2], %s3344_s16  ;;  %p4421_p11 = pnand %p3700_p6, %p57_p10 }
  0x81   : > { %s614_s4 = sshll.u32 %s607_s15, 4  ;;  %s604_s29 = scalar_lea.sflag [#allocation3], %s4412_s26  ;;  %s4425_s4 = int_to_ptr.vmem [resolvable:$true] %s614_s4 }
  0x82   : > { %p3969_p9 = pneg %p4421_p11 }
  0x85   : > { %s4419_s21 = scalar_lea.hbm %s5280_s30, %s3345_s25  ;;  %s3972_s17 = scalar_lea.hbm %s5280_s30, 256 }
  0x86   : > { %s3967_s11 = scalar_lea.hbm %s4419_s21, 128  ;;  %p3973_p1 = scmp.lt.u32.totalorder %s4419_s21, %s5280_s30 }
  0x87   : > { %p3968_p7 = scmp.ne.s32.totalorder %s4419_s21, %s3967_s11  ;;  %p3974_p2 = scmp.lt.u32.totalorder %s3972_s17, %s3967_s11 }
  0x88   : > { %p3976_p8 = scmp.lt.u32.totalorder %s3967_s11, %s4419_s21 }
  0x89   : > { %p3970_p12 = pnand %p3969_p9, %p3968_p7  ;;  %p3975_p4 = por %p3974_p2, %p3973_p1 }
  0x8b   : > { %p3971_p0 = pneg %p3970_p12  ;;  %p3977_p13 = por %p3976_p8, %p3975_p4 }
  0x8d   : > { %p3978_p6 = pnand %p3977_p13, %p3971_p0 }
  0x8f   : > { %3981 = shalt.err (!%p3978_p6)
}
  0x90   : > { %s3982_s9 = scalar_lea.vmem %s4425_s4, 128  ;;  %s4128_s25 = smov [#allocation2]  }
  0x91   : > { %p3983_p10 = scmp.ne.s32.totalorder %s4425_s4, %s3982_s9  ;;  %s3987_s16 = sshll.u32 %s4128_s25, 4  ;;  %s3988_s16 = int_to_ptr.vmem [resolvable:$false] %s3987_s16 }
  0x92   : > { %s3989_s28 = scalar_lea.vmem %s3988_s16, 256  ;;  %p3990_p12 = scmp.lt.s32.totalorder %s4425_s4, %s3988_s16 }
  0x93   : > { %p3985_p3 = pnand %p3983_p10, %p3969_p9  ;;  %p3991_p1 = scmp.lt.s32.totalorder %s3989_s28, %s3982_s9 }
  0x95   : > { %p3986_p7 = pneg %p3985_p3  ;;  %p3992_p2 = por %p3991_p1, %p3990_p12 }
  0x97   : > { %p3993_p4 = pnand %p3992_p2, %p3986_p7 }
  0x99   : > { %3996 = shalt.err (!%p3993_p4)
}
  0x9a   : > { %3689 = dma.hbm_to_vmem [thread:$0]  (!%p4421_p11), %s4419_s21, 128, %s4425_s4, %s604_s29  }
  0x9b   : > { %s3346_s11 = sshll.u32 %s4113_s24, 4  ;;  %s5282_s25 = sld [smem:[#allocation20_spill]] }
  0x9c   : > { %s624_s9 = scalar_lea.vmem [#allocation5], %s4412_s26  ;;  %s5283_s28 = sand.u32 1, %s4113_s24  }
  0x9d   : > { %s631_s16 = sshll.u32 %s624_s9, 4  ;;  %s622_s10 = scalar_lea.sflag [#allocation6], %s5283_s28  ;;  %s632_s16 = int_to_ptr.vmem [resolvable:$true] %s631_s16 }
  0xa1   : > { %s4458_s6 = scalar_lea.hbm %s5282_s25, %s3346_s11  ;;  %s4002_s29 = scalar_lea.hbm %s5282_s25, 32 }
  0xa2   : > { %s3997_s19 = scalar_lea.hbm %s4458_s6, 16  ;;  %p4003_p6 = scmp.lt.u32.totalorder %s4458_s6, %s5282_s25 }
  0xa3   : > { %p3998_p0 = scmp.ne.s32.totalorder %s4458_s6, %s3997_s19  ;;  %p4004_p10 = scmp.lt.u32.totalorder %s4002_s29, %s3997_s19 }
  0xa4   : > { %p4006_p7 = scmp.lt.u32.totalorder %s3997_s19, %s4458_s6 }
  0xa5   : > { %p4000_p8 = pnand %p3998_p0, %p3969_p9  ;;  %p4005_p3 = por %p4004_p10, %p4003_p6 }
  0xa7   : > { %p4001_p13 = pneg %p4000_p8  ;;  %p4007_p12 = por %p4006_p7, %p4005_p3 }
  0xa9   : > { %p4008_p1 = pnand %p4007_p12, %p4001_p13 }
  0xab   : > { %4011 = shalt.err (!%p4008_p1)
}
  0xac   : > { %s4012_s26 = scalar_lea.vmem %s632_s16, 16  ;;  %s4129_s15 = smov [#allocation5]  }
  0xad   : > { %p4013_p2 = scmp.ne.s32.totalorder %s632_s16, %s4012_s26  ;;  %s4017_s9 = sshll.u32 %s4129_s15, 4  ;;  %s4018_s9 = int_to_ptr.vmem [resolvable:$false] %s4017_s9 }
  0xae   : > { %s4019_s28 = scalar_lea.vmem %s4018_s9, 32  ;;  %p4020_p8 = scmp.lt.s32.totalorder %s632_s16, %s4018_s9 }
  0xaf   : > { %p4015_p4 = pnand %p4013_p2, %p3969_p9  ;;  %p4021_p5 = scmp.lt.s32.totalorder %s4019_s28, %s4012_s26 }
  0xb1   : > { %p4016_p0 = pneg %p4015_p4  ;;  %p4022_p6 = por %p4021_p5, %p4020_p8 }
  0xb3   : > { %p4023_p10 = pnand %p4022_p6, %p4016_p0 }
  0xb5   : > { %4026 = shalt.err (!%p4023_p10)
}
  0xb6   : > { %3692 = dma.hbm_to_vmem [thread:$0]  (!%p4421_p11), %s4458_s6, 16, %s632_s16, %s622_s10  }
  0xb7   : > { %p5284_p13 = scmp.ne.s32.totalorder %s5271_s27, 0 }
  0xb8   : > { %s4485_s19 = sand.u32 (!%p5284_p13), 1, %s4105_s22   ;;  %p5285_p9 = scmp.ne.s32.totalorder (!%p5284_p13), %s5268_s3, 0 }
  0xb9   : > { %646 = sbr.rel (%p5284_p13) target bundleno = 3141 (0xc45), region = 96  ;;  %s3348_s21 = sshll.u32 (!%p5284_p13), %s4485_s19, 3 }
  0xba   : > { %s649_s4 = scalar_lea.sflag (!%p5284_p13), [#allocation3], %s4485_s19  ;;  %s652_s29 = scalar_lea.vmem (!%p5284_p13), [#allocation2], %s3348_s21 }
  0xc0   : > { %4080 = dma.done.wait (%p5285_p9), %s649_s4, 128  }
  0xc1   : > { %4082 = vsyncadd (%p5285_p9), %s649_s4, 4294967168  ;;  %s657_s6 = sand.u32 1, %s4274_s2   ;;  %s660_s27 = scalar_lea.vmem [#allocation5], %s4485_s19 }
  0xc2   : > { %s658_s10 = scalar_lea.sflag [#allocation6], %s657_s6 }
  0xc3   : > { %4084 = dma.done.wait (%p5285_p9), %s658_s10, 16  }
  0xc4   : > { %4086 = vsyncadd (%p5285_p9), %s658_s10, 4294967280  ;;  %p5286_p5 = scmp.eq.s32.totalorder %s4274_s2, 0 }
  0xc6   : > { %4088 = dma.done.wait (%p5286_p5), [#allocation6], 2560   ;;  %p5287_p11 = pmov %p5286_p5 }
  0xc7   : > { %p5288_p3 = pmov %p5286_p5 }
  0xc8   : > { %4090 = vsyncadd (%p5287_p11), [#allocation6], 4294964736 }
  0xc9   : > { %4092 = dma.done.wait (%p5288_p3), [#allocation9], 2560   ;;  %p5289_p7 = pmov %p5288_p3 }
  0xca   : > { %p738_p12 = scmp.lt.s32.totalorder %s4274_s2, 1  ;;  %v745_v0 = vld [vmem:[%s652_s29] sm:$0xff]   ;;  %s4524_s28 = smov 0  }
  0xcb   : > { %4094 = vsyncadd (%p5289_p7), [#allocation9], 4294964736  ;;  %v4519_v1 = vld [vmem:[%s660_s27] ss:$0 sm:$0xff] }
  0xcc   : > { %s4509_s0 = scalar_select %p738_p12, %s4274_s2, 1 }
  0xcd LB: >> { %v4130_v2 = vmov 0.0   ;;  %vm4131_vm0 = vmmov 0   ;;  %s4536_s21 = sshll.u32 %s4121_s28, 4  ;;  %s5290_s6 = sld [smem:[#allocation23_spill]]  ;;  %v754_v5 = vpack.c.bf16 %v4117_v0, %v4117_v0  ;;  %vm782_vm1 = vcmask 261120   ;;  %s4121_s28 = sphi %s4524_s28, %s752_s28   ;;  %v4117_v0 = vphi %v745_v0, %v5297_v0  }
  0xce   : >> { %3478 = vmatprep.subr.bf16.mxu0 %v4130_v2  ;;  %3482 = vmatprep.mubr.msk.bf16.mxu0 %vm4131_vm0, %v4130_v2  ;;  %s2823_s27 = scalar_lea.vmem [#allocation8], %s4536_s21  ;;  %s2926_s3 = scalar_lea.vmem [#allocation10], %s4536_s21  ;;  %v4132_v6 = vmov 1966171168   ;;  %v852_v8 = vlaneseq  ;;  %vm1044_vm2 = vcmask 64512   ;;  %vm1009_vm3 = vcmask 1040384  }
  0xcf   : >> { %3486 = vmatprep.subr.bf16.mxu1 %v4130_v2  ;;  %3488 = vmatprep.mubr.msk.bf16.mxu1 %vm4131_vm0, %v4130_v2  ;;  %v850_v7 = vunpack.c.l.s4 %v4132_v6  ;;  %s762_s26 = scalar_lea.vmem %s5225_s5, %s4121_s28  ;;  %s4561_s4 = sshll.u32 %s4121_s28, 5  ;;  %vm1018_vm4 = vcmask 1041408   ;;  %vm1027_vm5 = vcmask 1042432   ;;  %vm1995_vm6 = vcmask 60416  }
  0xd0   : >> { %v853_v10 = vshrl.u32 %v852_v8, 7  ;;  %v3354_v11 = vld [vmem:[%s762_s26] ss:$0 sm:$0xff]  ;;  %s4576_s26 = scalar_lea.vmem %s5232_s12, %s4561_s4  ;;  %s4133_s29 = smov 104   ;;  %vm2095_vm7 = vcmask 1043456   ;;  %vm2478_vm8 = vcmask 1041409  }
  0xd1   : >> { %v851_v9 = vunpack.c.0.s8 %v850_v7  ;;  %s4136_s16 = smov 96   ;;  %s4137_s17 = smov 88   ;;  %vm2481_vm9 = vcmask 1042434   ;;  %vm2484_vm10 = vcmask 1043459   ;;  %vm2487_vm11 = vcmask 1044484  }
  0xd2   : >> { %v4580_v24 = vsub.s32 0, %v853_v10  ;;  %s4138_s9 = smov 80   ;;  %s4139_s11 = smov 72   ;;  %vm2490_vm12 = vcmask 1045509   ;;  %vm2493_vm13 = vcmask 1046534   ;;  %vm2496_vm14 = vcmask 1047559  }
  0xd3   : >> { %s757_s10 = scalar_lea.vmem %s5290_s6, %s4536_s21  ;;  %v4558_v12 = vsub.s32 %v851_v9, %v853_v10  ;;  %s4134_s6 = smov 120   ;;  %vm2817_vm15 = vcmask 130048  }
  0xd4   : >> { %v3835_v3 = vld [vmem:[%s757_s10] sm:$0xff]   ;;  %v3836_v4 = vld [vmem:[%s757_s10 + $0x8] sm:$0xff]   ;;  %s5291_s10 = sld [smem:[#allocation21_spill]] }
  0xd5   : >> { %3479 = vmatpush3.bf16.msra.mxu0 %v3835_v3 }
  0xd6   : >> { %3480 = vmatprep.subr.bf16.mxu0 %v4130_v2 }
  0xd9   : >> { %3481 = vmatpush3.bf16.msra.mxu0 %v3836_v4 }
  0xda   : >> { %3492 = vmatprep.subr.bf16.mxu0 %v4130_v2  ;;  %s4567_s15 = scalar_lea.vmem %s5291_s10, %s4561_s4  ;;  %s4135_s10 = smov 112  }
  0xdb   : >> { %v829_v16 = vld [vmem:[%s4567_s15] sm:$0xf]  ;;  %v830_v17 = vld [vmem:[%s4567_s15 + $0x4] sm:$0xf]  ;;  %v832_v62 = vld [vmem:[%s4567_s15 + $0xc] sm:$0xf] }
  0xdc   : >> { %3483 = vmatmul.mubr.msk.bf16.vlgmr.msra.gmra.mrb[0].mxu0 %vm782_vm1, %v754_v5  ;;  %v1049_v19 = vsel %vm1044_vm2, %v829_v16, 0  ;;  %v1095_v20 = vsel %vm1044_vm2, %v830_v17, 0  ;;  %v831_v5 = vld [vmem:[%s4567_s15 + $0x8] sm:$0xf] }
  0xdd   : >> { %3494 = vmatprep.mubr.msk.bf16.mxu0 %vm4131_vm0, %v4130_v2  ;;  %3487 = vmatpush3.bf16.xpose.msra.mxu1 %v1049_v19 }
  0xde   : >> { %3498 = vmatprep.subr.bf16.mxu1 %v4130_v2 }
  0xe2   : >> { %3493 = vmatpush3.bf16.xpose.msra.mxu0 %v1095_v20 }
  0xe3   : >> { %3504 = vmatprep.subr.bf16.mxu0 %v4130_v2 }
 0x1af   : >> { %v820_v13 = vpop.f32.mrb[0].mxu0 }
 0x1b0   : >> { %v821_v14 = vadd.f32 %v3354_v11, %v820_v13  ;;  %v3484_v15 = vpop.f32.mrb[1].mxu0 }
 0x1b1   : >> { %v823_v18 = vpop.f32.mrb[2].mxu0 }
 0x1b2   : >> { %v848_v21 = vcombine.high %v821_v14, %v821_v14  ;;  %v855_v22 = vrot.slane %v821_v14, %v4558_v12  ;;  %v3485_v23 = vpop.f32.mrb[3].mxu0  ;;  %v4632_v48 = vpack.c.bf16 %v821_v14, %v821_v14  ;;  %v1187_v14 = vsel %vm1044_vm2, %v832_v62, 0 }
 0x1b3   : >> { %v1141_v18 = vsel %vm1044_vm2, %v831_v5, 0 }
 0x1b4   : >> { %v863_v25 = vcombine.high %v855_v22, %v855_v22  ;;  %v4585_v26 = vrot.slane %v855_v22, %v4558_v12  ;;  %v862_v27 = vrot.slane %v848_v21, %v4558_v12 }
 0x1b6   : >> { %v885_v28 = vrot.slane %v863_v25, %v4558_v12  ;;  %v908_v29 = vrot.slane %v4585_v26, %v4580_v24  ;;  %v4594_v31 = vcombine.high %v4585_v26, %v4585_v26  ;;  %v864_v33 = vcombine.high %v862_v27, %v862_v27 }
 0x1b7   : >> { %v4608_v39 = vrot.slane %v862_v27, %v4558_v12  ;;  %v833_v27 = vld [vmem:[%s4567_s15 + $0x10] sm:$0xf] }
 0x1b8   : >> { %v912_v30 = vrot.slane %v885_v28, %v4580_v24  ;;  %v4596_v32 = vcombine.high %v885_v28, %v885_v28  ;;  %v916_v36 = vrot.slane %v4594_v31, %v4580_v24  ;;  %v4605_v37 = vrot.slane %v864_v33, %v4558_v12 }
 0x1b9   : >> { %v924_v42 = vrot.slane %v4608_v39, %v4580_v24  ;;  %v4622_v43 = vcombine.high %v4608_v39, %v4608_v39 }
 0x1ba   : >> { %v3785_v34 = vpack.i.bf16 %v912_v30, %v908_v29  ;;  %v920_v35 = vrot.slane %v4596_v32, %v4580_v24  ;;  %v928_v40 = vrot.slane %v4605_v37, %v4580_v24  ;;  %v4615_v41 = vcombine.high %v4605_v37, %v4605_v37 }
 0x1bb   : >> { %v932_v46 = vrot.slane %v4622_v43, %v4580_v24 }
 0x1bc   : >> { %3786 = vrot.lane.b32.xlu1 %v3785_v34, %s4133_s29  ;;  %3776 = vrot.lane.b32.xlu0 %v3785_v34, %s4134_s6  ;;  %v3790_v38 = vpack.i.bf16 %v920_v35, %v916_v36  ;;  %v3810_v44 = vpack.i.bf16 %v928_v40, %v924_v42  ;;  %v936_v45 = vrot.slane %v4615_v41, %v4580_v24 }
 0x1be   : >> { %v3820_v47 = vpack.i.bf16 %v936_v45, %v932_v46 }
 0x1c0   : >> { %3781 = vrot.lane.b32.xlu0 %v3785_v34, %s4135_s10  ;;  %3791 = vrot.lane.b32.xlu1 %v3790_v38, %s4134_s6  ;;  %v1233_v34 = vsel %vm1044_vm2, %v833_v27, 0 }
 0x1c4   : >> { %3796 = vrot.lane.b32.xlu0 %v3790_v38, %s4135_s10  ;;  %3801 = vrot.lane.b32.xlu1 %v3790_v38, %s4133_s29 }
 0x1c8   : >> { %3811 = vrot.lane.b32.xlu1 %v3810_v44, %s4135_s10  ;;  %3806 = vrot.lane.b32.xlu0 %v3810_v44, %s4134_s6 }
 0x1cc   : >> { %3816 = vrot.lane.b32.xlu0 %v3810_v44, %s4133_s29  ;;  %3821 = vrot.lane.b32.xlu1 %v3820_v47, %s4134_s6 }
 0x1d0   : >> { %3826 = vrot.lane.b32.xlu0 %v3820_v47, %s4135_s10  ;;  %3831 = vrot.lane.b32.xlu1 %v3820_v47, %s4133_s29 }
 0x1d4   : >> { %1415 = vrot.lane.b32.xlu0 %v4632_v48, %s4136_s16  ;;  %1465 = vrot.lane.b32.xlu1 %v4632_v48, %s4137_s17  ;;  %s5293_s16 = sld [smem:[#allocation27_spill]] }
 0x1d8   : >> { %1515 = vrot.lane.b32.xlu0 %v4632_v48, %s4138_s9  ;;  %1463 = vrot.lane.b32.xlu1 %v4632_v48, %s4134_s6  ;;  %s4141_s9 = smov 48   ;;  %s4144_s6 = smov 8  }
 0x1da   : >> { %s2931_s17 = scalar_lea.vmem %s5293_s16, %s4121_s28 }
 0x1dc   : >> { %1565 = vrot.lane.b32.xlu0 %v4632_v48, %s4139_s11  ;;  %1513 = vrot.lane.b32.xlu1 %v4632_v48, %s4135_s10  ;;  %s4140_s11 = smov 56   ;;  %s4146_s10 = smov 24  }
 0x1e0   : >> { %1563 = vrot.lane.b32.xlu0 %v4632_v48, %s4133_s29  ;;  %s4142_s29 = smov 64  }
 0x22e   : >> { %v3787_v49 = vpop.permute.xlu1 %3786  ;;  %v3777_v50 = vpop.permute.xlu0 %3776 }
 0x22f   : >> { %v3779_v51 = vunpack.i.h.bf16 %v3777_v50  ;;  %v3778_v52 = vunpack.i.l.bf16 %v3777_v50  ;;  %v3789_v55 = vunpack.i.h.bf16 %v3787_v49  ;;  %v3788_v58 = vunpack.i.l.bf16 %v3787_v49 }
 0x231   : >> { %v1011_v59 = vsel %vm1009_vm3, %v885_v28, %v3779_v51  ;;  %v1010_v60 = vsel %vm1009_vm3, %v4585_v26, %v3778_v52 }
 0x232   : >> { %v3782_v53 = vpop.permute.xlu0 %3781  ;;  %v3792_v54 = vpop.permute.xlu1 %3791 }
 0x233   : >> { %v3784_v56 = vunpack.i.h.bf16 %v3782_v53  ;;  %v3783_v57 = vunpack.i.l.bf16 %v3782_v53  ;;  %v3794_v61 = vunpack.i.h.bf16 %v3792_v54  ;;  %v3793_v4 = vunpack.i.l.bf16 %v3792_v54  ;;  %v835_v54 = vld [vmem:[%s4567_s15 + $0x18] sm:$0xf] }
 0x235   : >> { %v1019_v63 = vsel %vm1018_vm4, %v1010_v60, %v3783_v57  ;;  %v1020_v3 = vsel %vm1018_vm4, %v1011_v59, %v3784_v56  ;;  %v1013_v15 = vsel %vm1009_vm3, %v4596_v32, %v3794_v61  ;;  %v1012_v19 = vsel %vm1009_vm3, %v4594_v31, %v3793_v4  ;;  %v834_v31 = vld [vmem:[%s4567_s15 + $0x14] sm:$0xf] }
 0x236   : >> { %v1029_v6 = vsel %vm1027_vm5, %v1020_v3, %v3789_v55  ;;  %v3797_v7 = vpop.permute.xlu0 %3796  ;;  %v3802_v8 = vpop.permute.xlu1 %3801  ;;  %v1028_v9 = vsel %vm1027_vm5, %v1019_v63, %v3788_v58  ;;  %v1279_v42 = vsel %vm1044_vm2, %v834_v31, 0  ;;  %v836_v55 = vld [vmem:[%s4567_s15 + $0x1c] sm:$0xf]  ;;  %v1325_v61 = vsel %vm1044_vm2, %v835_v54, 0  ;;  %s4912_s15 = scalar_lea.vmem [#allocation7], %s4561_s4  ;;  %s4143_s4 = smov 40  }
 0x237   : >> { %v1037_v10 = vpack.c.bf16 %v1029_v6, %v1029_v6  ;;  %v3799_v11 = vunpack.i.h.bf16 %v3797_v7  ;;  %v3798_v13 = vunpack.i.l.bf16 %v3797_v7  ;;  %v3804_v16 = vunpack.i.h.bf16 %v3802_v8 }
 0x238   : >> { %v1036_v17 = vpack.c.bf16 %v1028_v9, %v1028_v9  ;;  %v3803_v21 = vunpack.i.l.bf16 %v3802_v8  ;;  %v1371_v62 = vsel %vm1044_vm2, %v836_v55, 0 }
 0x239   : >> { %v1022_v20 = vsel %vm1018_vm4, %v1013_v15, %v3799_v11  ;;  %3495 = vmatmul.mubr.msk.bf16.vlgmr.msra.gmra.mrb[4].mxu0 %vm1044_vm2, %v1037_v10  ;;  %v1021_v22 = vsel %vm1018_vm4, %v1012_v19, %v3798_v13 }
 0x23a   : >> { %3489 = vmatmul.mubr.msk.bf16.vlgmr.msra.gmra.mrb[0].mxu1 %vm1044_vm2, %v1036_v17  ;;  %3505 = vmatpush3.bf16.xpose.msra.mxu0 %v1187_v14  ;;  %v3812_v23 = vpop.permute.xlu1 %3811  ;;  %v3807_v25 = vpop.permute.xlu0 %3806  ;;  %v1031_v26 = vsel %vm1027_vm5, %v1022_v20, %v3804_v16  ;;  %v1030_v28 = vsel %vm1027_vm5, %v1021_v22, %v3803_v21 }
 0x23b   : >> { %3499 = vmatpush3.bf16.xpose.msra.mxu1 %v1141_v18  ;;  %3500 = vmatprep.mubr.msk.bf16.mxu1 %vm4131_vm0, %v4130_v2  ;;  %v3809_v29 = vunpack.i.h.bf16 %v3807_v25  ;;  %v3808_v30 = vunpack.i.l.bf16 %v3807_v25  ;;  %v1039_v33 = vpack.c.bf16 %v1031_v26, %v1031_v26  ;;  %v1038_v35 = vpack.c.bf16 %v1030_v28, %v1030_v28 }
 0x23c   : >> { %3506 = vmatprep.mubr.msk.bf16.mxu0 %vm4131_vm0, %v4130_v2  ;;  %3510 = vmatprep.subr.bf16.mxu1 %v4130_v2  ;;  %v3814_v36 = vunpack.i.h.bf16 %v3812_v23  ;;  %v3813_v38 = vunpack.i.l.bf16 %v3812_v23 }
 0x23d   : >> { %3516 = vmatprep.subr.bf16.mxu0 %v4130_v2  ;;  %v1015_v44 = vsel %vm1009_vm3, %v4605_v37, %v3809_v29  ;;  %v1014_v45 = vsel %vm1009_vm3, %v4608_v39, %v3808_v30 }
 0x23e   : >> { %v3817_v32 = vpop.permute.xlu0 %3816  ;;  %v3822_v40 = vpop.permute.xlu1 %3821  ;;  %v1023_v50 = vsel %vm1018_vm4, %v1014_v45, %v3813_v38  ;;  %v1024_v51 = vsel %vm1018_vm4, %v1015_v44, %v3814_v36 }
 0x23f   : >> { %v3819_v46 = vunpack.i.h.bf16 %v3817_v32  ;;  %v3818_v47 = vunpack.i.l.bf16 %v3817_v32  ;;  %v3824_v52 = vunpack.i.h.bf16 %v3822_v40  ;;  %v3823_v53 = vunpack.i.l.bf16 %v3822_v40 }
 0x241   : >> { %3507 = vmatmul.mubr.msk.bf16.vlgmr.msra.gmra.mrb[8].mxu0 %vm1044_vm2, %v1039_v33  ;;  %v1032_v37 = vsel %vm1027_vm5, %v1023_v50, %v3818_v47  ;;  %v1033_v39 = vsel %vm1027_vm5, %v1024_v51, %v3819_v46  ;;  %v1017_v63 = vsel %vm1009_vm3, %v4615_v41, %v3824_v52  ;;  %v1016_v3 = vsel %vm1009_vm3, %v4622_v43, %v3823_v53 }
 0x242   : >> { %3501 = vmatmul.mubr.msk.bf16.vlgmr.msra.gmra.mrb[4].mxu1 %vm1044_vm2, %v1038_v35  ;;  %3517 = vmatpush3.bf16.xpose.msra.mxu0 %v1279_v42  ;;  %v3827_v49 = vpop.permute.xlu0 %3826  ;;  %v3832_v58 = vpop.permute.xlu1 %3831  ;;  %v1040_v59 = vpack.c.bf16 %v1032_v37, %v1032_v37  ;;  %v1041_v60 = vpack.c.bf16 %v1033_v39, %v1033_v39 }
 0x243   : >> { %3511 = vmatpush3.bf16.xpose.msra.mxu1 %v1233_v34  ;;  %3512 = vmatprep.mubr.msk.bf16.mxu1 %vm4131_vm0, %v4130_v2  ;;  %v3829_v56 = vunpack.i.h.bf16 %v3827_v49  ;;  %v3828_v57 = vunpack.i.l.bf16 %v3827_v49  ;;  %v3834_v4 = vunpack.i.h.bf16 %v3832_v58  ;;  %v3833_v5 = vunpack.i.l.bf16 %v3832_v58 }
 0x244   : >> { %3518 = vmatprep.mubr.msk.bf16.mxu0 %vm4131_vm0, %v4130_v2  ;;  %3522 = vmatprep.subr.bf16.mxu1 %v4130_v2 }
 0x245   : >> { %3528 = vmatprep.subr.bf16.mxu0 %v4130_v2  ;;  %v1025_v6 = vsel %vm1018_vm4, %v1016_v3, %v3828_v57  ;;  %v1026_v7 = vsel %vm1018_vm4, %v1017_v63, %v3829_v56 }
 0x246   : >> { %v1416_v8 = vpop.permute.xlu0 %1415  ;;  %v1034_v41 = vsel %vm1027_vm5, %v1025_v6, %v3833_v5  ;;  %v1035_v43 = vsel %vm1027_vm5, %v1026_v7, %v3834_v4  ;;  %v1466_v9 = vpop.permute.xlu1 %1465 }
 0x247   : >> { %v1042_v10 = vpack.c.bf16 %v1034_v41, %v1034_v41  ;;  %v1043_v11 = vpack.c.bf16 %v1035_v43, %v1035_v43  ;;  %v1421_v14 = vsel %vm1044_vm2, %v1416_v8, 0  ;;  %v1471_v15 = vsel %vm1044_vm2, %v1466_v9, 0 }
 0x249   : >> { %3519 = vmatmul.mubr.msk.bf16.vlgmr.msra.gmra.mrb[12].mxu0 %vm1044_vm2, %v1041_v60 }
 0x24a   : >> { %3513 = vmatmul.mubr.msk.bf16.vlgmr.msra.gmra.mrb[8].mxu1 %vm1044_vm2, %v1040_v59  ;;  %3529 = vmatpush3.bf16.xpose.msra.mxu0 %v1371_v62  ;;  %v1516_v13 = vpop.permute.xlu0 %1515  ;;  %v1464_v17 = vpop.permute.xlu1 %1463 }
 0x24b   : >> { %3523 = vmatpush3.bf16.xpose.msra.mxu1 %v1325_v61  ;;  %3524 = vmatprep.mubr.msk.bf16.mxu1 %vm4131_vm0, %v4130_v2  ;;  %v1521_v18 = vsel %vm1044_vm2, %v1516_v13, 0 }
 0x24c   : >> { %3530 = vmatprep.mubr.msk.bf16.mxu0 %vm4131_vm0, %v4130_v2  ;;  %3534 = vmatprep.subr.bf16.mxu1 %v4130_v2 }
 0x24d   : >> { %3540 = vmatprep.subr.bf16.mxu0 %v4130_v2 }
 0x24e   : >> { %v1566_v16 = vpop.permute.xlu0 %1565  ;;  %v1514_v20 = vpop.permute.xlu1 %1513 }
 0x24f   : >> { %v1571_v19 = vsel %vm1044_vm2, %v1566_v16, 0 }
 0x251   : >> { %3531 = vmatmul.mubr.msk.bf16.vlgmr.msra.gmra.mrb[16].mxu0 %vm1044_vm2, %v1043_v11 }
 0x252   : >> { %3525 = vmatmul.mubr.msk.bf16.vlgmr.msra.gmra.mrb[12].mxu1 %vm1044_vm2, %v1042_v10  ;;  %3541 = vmatpush3.bf16.xpose.msra.mxu0 %v1471_v15  ;;  %v1564_v21 = vpop.permute.xlu0 %1563 }
 0x253   : >> { %3535 = vmatpush3.bf16.xpose.msra.mxu1 %v1421_v14  ;;  %3536 = vmatprep.mubr.msk.bf16.mxu1 %vm4131_vm0, %v4130_v2 }
 0x254   : >> { %3542 = vmatprep.mubr.msk.bf16.mxu0 %vm4131_vm0, %v4130_v2  ;;  %3546 = vmatprep.subr.bf16.mxu1 %v4130_v2 }
 0x255   : >> { %3552 = vmatprep.subr.bf16.mxu0 %v4130_v2 }
 0x259   : >> { %3543 = vmatmul.mubr.msk.bf16.vlgmr.msra.gmra.mrb[20].mxu0 %vm1044_vm2, %v1464_v17 }
 0x25a   : >> { %3537 = vmatmul.mubr.msk.bf16.vlgmr.msra.gmra.mrb[16].mxu1 %vm1044_vm2, %v4632_v48  ;;  %3553 = vmatpush3.bf16.xpose.msra.mxu0 %v1571_v19 }
 0x25b   : >> { %3547 = vmatpush3.bf16.xpose.msra.mxu1 %v1521_v18  ;;  %3548 = vmatprep.mubr.msk.bf16.mxu1 %vm4131_vm0, %v4130_v2 }
 0x25c   : >> { %3554 = vmatprep.mubr.msk.bf16.mxu0 %vm4131_vm0, %v4130_v2  ;;  %3558 = vmatprep.subr.bf16.mxu1 %v4130_v2 }
 0x25d   : >> { %3564 = vmatprep.subr.bf16.mxu0 %v4130_v2 }
 0x261   : >> { %3555 = vmatmul.mubr.msk.bf16.vlgmr.msra.gmra.mrb[24].mxu0 %vm1044_vm2, %v1564_v21 }
 0x262   : >> { %3549 = vmatmul.mubr.msk.bf16.vlgmr.msra.gmra.mrb[20].mxu1 %vm1044_vm2, %v1514_v20  ;;  %3566 = vmatprep.mubr.msk.bf16.mxu0 %vm4131_vm0, %v4130_v2 }
 0x263   : >> { %3560 = vmatprep.mubr.msk.bf16.mxu1 %vm4131_vm0, %v4130_v2 }
 0x30c   : >> { %v4737_v22 = vpop.f32.mrb[4].mxu0 }
 0x30d   : >> { %v4739_v23 = vpop.f32.mrb[0].mxu1  ;;  %v3496_v25 = vpop.f32.mrb[5].mxu0 }
 0x30e   : >> { %v3490_v26 = vpop.f32.mrb[1].mxu1  ;;  %v1134_v27 = vpop.f32.mrb[6].mxu0 }
 0x30f   : >> { %v1088_v28 = vpop.f32.mrb[2].mxu1  ;;  %v3497_v29 = vpop.f32.mrb[7].mxu0 }
 0x310   : >> { %v3491_v30 = vpop.f32.mrb[3].mxu1 }
 0x314   : >> { %v4741_v31 = vpop.f32.mrb[8].mxu0 }
 0x315   : >> { %v4743_v32 = vpop.f32.mrb[4].mxu1  ;;  %v3508_v33 = vpop.f32.mrb[9].mxu0 }
 0x316   : >> { %v3502_v34 = vpop.f32.mrb[5].mxu1  ;;  %v1226_v35 = vpop.f32.mrb[10].mxu0 }
 0x317   : >> { %v1180_v36 = vpop.f32.mrb[6].mxu1  ;;  %v3509_v38 = vpop.f32.mrb[11].mxu0 }
 0x318   : >> { %v3503_v40 = vpop.f32.mrb[7].mxu1 }
 0x31c   : >> { %v4747_v44 = vpop.f32.mrb[12].mxu0 }
 0x31d   : >> { %v4745_v42 = vpop.f32.mrb[8].mxu1  ;;  %v3520_v46 = vpop.f32.mrb[13].mxu0 }
 0x31e   : >> { %v3514_v45 = vpop.f32.mrb[9].mxu1  ;;  %v1318_v49 = vpop.f32.mrb[14].mxu0 }
 0x31f   : >> { %v1272_v47 = vpop.f32.mrb[10].mxu1  ;;  %v3521_v51 = vpop.f32.mrb[15].mxu0 }
 0x320   : >> { %v3515_v50 = vpop.f32.mrb[11].mxu1 }
 0x324   : >> { %v4751_v39 = vpop.f32.mrb[16].mxu0 }
 0x325   : >> { %v4749_v37 = vpop.f32.mrb[12].mxu1  ;;  %v3532_v53 = vpop.f32.mrb[17].mxu0 }
 0x326   : >> { %v3526_v52 = vpop.f32.mrb[13].mxu1  ;;  %v1410_v55 = vpop.f32.mrb[18].mxu0 }
 0x327   : >> { %v1364_v54 = vpop.f32.mrb[14].mxu1  ;;  %v3533_v57 = vpop.f32.mrb[19].mxu0 }
 0x328   : >> { %v3527_v56 = vpop.f32.mrb[15].mxu1 }
 0x32c   : >> { %v1507_v59 = vpop.f32.mrb[20].mxu0 }
 0x32d   : >> { %v1457_v58 = vpop.f32.mrb[16].mxu1  ;;  %v1672_v62 = vcombine.high %v1507_v59, %v1507_v59  ;;  %v1679_v63 = vrot.slane %v1507_v59, %v4558_v12  ;;  %v3544_v4 = vpop.f32.mrb[21].mxu0 }
 0x32e   : >> { %v1614_v60 = vcombine.high %v1457_v58, %v1457_v58  ;;  %v1621_v61 = vrot.slane %v1457_v58, %v4558_v12  ;;  %v3538_v3 = vpop.f32.mrb[17].mxu1  ;;  %v1510_v6 = vpop.f32.mrb[22].mxu0 }
 0x32f   : >> { %v1460_v5 = vpop.f32.mrb[18].mxu1  ;;  %v1686_v43 = vrot.slane %v1672_v62, %v4558_v12  ;;  %v3545_v10 = vpop.f32.mrb[23].mxu0  ;;  %v1687_v11 = vcombine.high %v1679_v63, %v1679_v63  ;;  %v1695_v13 = vrot.slane %v1679_v63, %v4558_v12 }
 0x330   : >> { %v1628_v7 = vrot.slane %v1614_v60, %v4558_v12  ;;  %v1629_v8 = vcombine.high %v1621_v61, %v1621_v61  ;;  %v1637_v41 = vrot.slane %v1621_v61, %v4558_v12  ;;  %v3539_v9 = vpop.f32.mrb[19].mxu1 }
 0x331   : >> { %v1688_v18 = vcombine.high %v1686_v43, %v1686_v43  ;;  %v4764_v19 = vrot.slane %v1686_v43, %v4558_v12  ;;  %v1709_v20 = vrot.slane %v1687_v11, %v4558_v12  ;;  %v1717_v21 = vcombine.high %v1695_v13, %v1695_v13 }
 0x332   : >> { %v1630_v14 = vcombine.high %v1628_v7, %v1628_v7  ;;  %v4760_v15 = vrot.slane %v1628_v7, %v4558_v12  ;;  %v1651_v16 = vrot.slane %v1629_v8, %v4558_v12  ;;  %v1659_v17 = vcombine.high %v1637_v41, %v1637_v41 }
 0x333   : >> { %v1824_v28 = vrot.slane %v1695_v13, %v4580_v24  ;;  %v4774_v29 = vrot.slane %v1688_v18, %v4558_v12  ;;  %v1718_v30 = vcombine.high %v4764_v19, %v4764_v19  ;;  %v1719_v33 = vcombine.high %v1709_v20, %v1709_v20 }
 0x334   : >> { %v4768_v25 = vrot.slane %v1630_v14, %v4558_v12  ;;  %v1660_v26 = vcombine.high %v4760_v15, %v4760_v15  ;;  %v1661_v27 = vcombine.high %v1651_v16, %v1651_v16  ;;  %v1828_v34 = vrot.slane %v1709_v20, %v4580_v24  ;;  %v1607_v36 = vpop.f32.mrb[24].mxu0 }
 0x335   : >> { %v1557_v35 = vpop.f32.mrb[20].mxu1  ;;  %v1832_v40 = vrot.slane %v1717_v21, %v4580_v24  ;;  %v1840_v45 = vrot.slane %v4764_v19, %v4580_v24  ;;  %v3556_v49 = vpop.f32.mrb[25].mxu0  ;;  %v1720_v50 = vcombine.high %v4774_v29, %v4774_v29  ;;  %v1836_v51 = vrot.slane %v1719_v33, %v4580_v24 }
 0x336   : >> { %v1662_v38 = vcombine.high %v4768_v25, %v4768_v25  ;;  %v1722_v46 = vcombine.high %v1557_v35, %v1557_v35  ;;  %v3550_v47 = vpop.f32.mrb[21].mxu1  ;;  %v1844_v52 = vrot.slane %v4774_v29, %v4580_v24  ;;  %v4790_v53 = vrot.slane %v1718_v30, %v4580_v24  ;;  %v1610_v55 = vpop.f32.mrb[26].mxu0 }
 0x337   : >> { %v1560_v54 = vpop.f32.mrb[22].mxu1  ;;  %v1729_v56 = vrot.slane %v1557_v35, %v4558_v12  ;;  %v1772_v58 = vcombine.high %v1607_v36, %v1607_v36  ;;  %v1779_v59 = vrot.slane %v1607_v36, %v4558_v12  ;;  %v3557_v61 = vpop.f32.mrb[27].mxu0  ;;  %v4796_v62 = vrot.slane %v1720_v50, %v4580_v24 }
 0x338   : >> { %v1736_v57 = vrot.slane %v1722_v46, %v4558_v12  ;;  %v3551_v60 = vpop.f32.mrb[23].mxu1  ;;  %v1941_v63 = vsel %vm1009_vm3, %v1637_v41, %v1824_v28  ;;  %v1942_v3 = vsel %vm1009_vm3, %v1651_v16, %v1828_v34  ;;  %v1944_v4 = vsel %vm1009_vm3, %v1661_v27, %v1836_v51 }
 0x339   : >> { %v1737_v5 = vcombine.high %v1729_v56, %v1729_v56  ;;  %v1745_v7 = vrot.slane %v1729_v56, %v4558_v12  ;;  %v1786_v43 = vrot.slane %v1772_v58, %v4558_v12  ;;  %v1787_v9 = vcombine.high %v1779_v59, %v1779_v59 }
 0x33a   : >> { %v1738_v6 = vcombine.high %v1736_v57, %v1736_v57  ;;  %v1752_v8 = vrot.slane %v1736_v57, %v4558_v12  ;;  %v1795_v10 = vrot.slane %v1779_v59, %v4558_v12  ;;  %v1943_v11 = vsel %vm1009_vm3, %v1659_v17, %v1832_v40 }
 0x33b   : >> { %v1759_v13 = vrot.slane %v1737_v5, %v4558_v12  ;;  %v1767_v14 = vcombine.high %v1745_v7, %v1745_v7  ;;  %v1864_v18 = vrot.slane %v1745_v7, %v4580_v24  ;;  %v1788_v21 = vcombine.high %v1786_v43, %v1786_v43 }
 0x33c   : >> { %v1766_v41 = vrot.slane %v1738_v6, %v4558_v12  ;;  %v1768_v16 = vcombine.high %v1752_v8, %v1752_v8  ;;  %v1880_v20 = vrot.slane %v1752_v8, %v4580_v24  ;;  %v1802_v27 = vrot.slane %v1786_v43, %v4558_v12 }
 0x33d   : >> { %v1769_v28 = vcombine.high %v1759_v13, %v1759_v13  ;;  %v1868_v30 = vrot.slane %v1759_v13, %v4580_v24  ;;  %v1872_v33 = vrot.slane %v1767_v14, %v4580_v24  ;;  %v1809_v35 = vrot.slane %v1787_v9, %v4558_v12 }
 0x33e   : >> { %v1770_v29 = vcombine.high %v1766_v41, %v1766_v41  ;;  %v1884_v17 = vrot.slane %v1766_v41, %v4580_v24  ;;  %v1888_v34 = vrot.slane %v1768_v16, %v4580_v24  ;;  %v1816_v36 = vrot.slane %v1788_v21, %v4558_v12 }
 0x33f   : >> { %v1876_v40 = vrot.slane %v1769_v28, %v4580_v24  ;;  %v1817_v46 = vcombine.high %v1795_v10, %v1795_v10  ;;  %v1818_v47 = vcombine.high %v1802_v27, %v1802_v27  ;;  %v1904_v49 = vrot.slane %v1795_v10, %v4580_v24 }
 0x340   : >> { %v1819_v50 = vcombine.high %v1809_v35, %v1809_v35  ;;  %v1820_v51 = vcombine.high %v1816_v36, %v1816_v36  ;;  %v1908_v54 = vrot.slane %v1809_v35, %v4580_v24  ;;  %v1920_v55 = vrot.slane %v1802_v27, %v4580_v24 }
 0x341   : >> { %v1912_v56 = vrot.slane %v1817_v46, %v4580_v24  ;;  %v1949_v57 = vsel %vm1018_vm4, %v1941_v63, %v1864_v18  ;;  %v1950_v58 = vsel %vm1018_vm4, %v1942_v3, %v1868_v30  ;;  %v1952_v12 = vsel %vm1018_vm4, %v1944_v4, %v1876_v40 }
 0x342   : >> { %v1957_v59 = vsel %vm1027_vm5, %v1949_v57, %v1904_v49  ;;  %v1958_v60 = vsel %vm1027_vm5, %v1950_v58, %v1908_v54  ;;  %v1916_v61 = vrot.slane %v1819_v50, %v4580_v24  ;;  %v1951_v5 = vsel %vm1018_vm4, %v1943_v11, %v1872_v33 }
 0x343   : >> { %v1965_v6 = vadd.f32 %v1957_v59, %v4739_v23  ;;  %v1966_v7 = vadd.f32 %v1958_v60, %v4737_v22  ;;  %v1959_v8 = vsel %vm1027_vm5, %v1951_v5, %v1912_v56  ;;  %v1924_v63 = vrot.slane %v1816_v36, %v4580_v24 }
 0x344   : >> { %v1960_v3 = vsel %vm1027_vm5, %v1952_v12, %v1916_v61  ;;  %v1967_v4 = vadd.f32 %v1959_v8, %v4743_v32  ;;  %v1946_v43 = vsel %vm1009_vm3, %v4768_v25, %v1844_v52  ;;  %v1945_v9 = vsel %vm1009_vm3, %v4760_v15, %v1840_v45 }
 0x345   : >> { %v1973_v23 = vmul.f32 0.35355338, %v1965_v6  ;;  %v1974_v10 = vmul.f32 0.35355338, %v1966_v7  ;;  %v1968_v22 = vadd.f32 %v1960_v3, %v4741_v31  ;;  %v1954_v11 = vsel %vm1018_vm4, %v1946_v43, %v1884_v17 }
 0x346   : >> { %v1975_v13 = vmul.f32 0.35355338, %v1967_v4  ;;  %v1962_v41 = vsel %vm1027_vm5, %v1954_v11, %v1924_v63  ;;  %v1953_v32 = vsel %vm1018_vm4, %v1945_v9, %v1880_v20  ;;  %v1892_v14 = vrot.slane %v1770_v29, %v4580_v24 }
 0x347   : >> { %v1987_v52 = vadd.f32 %v4519_v1, %v1973_v23  ;;  %v1988_v19 = vadd.f32 %v4519_v1, %v1974_v10  ;;  %v1976_v16 = vmul.f32 0.35355338, %v1968_v22  ;;  %v1970_v45 = vadd.f32 %v1962_v41, %v4747_v44 }
 0x348   : >> { %v1989_v18 = vadd.f32 %v4519_v1, %v1975_v13  ;;  %v1961_v31 = vsel %vm1027_vm5, %v1953_v32, %v1920_v55  ;;  %v1932_v21 = vrot.slane %v1820_v51, %v4580_v24  ;;  %v1948_v20 = vsel %vm1009_vm3, %v1662_v38, %v4796_v62 }
 0x349   : >> { %v1996_v27 = vsel %vm1995_vm6, %v1987_v52, -inf  ;;  %v1999_v28 = vsel %vm1995_vm6, %v1988_v19, -inf  ;;  %v1990_v29 = vadd.f32 %v4519_v1, %v1976_v16  ;;  %v1978_v30 = vmul.f32 0.35355338, %v1970_v45 }
 0x34a   : >> { %1997 = vmax.xlane.f32.xlu1 %v1996_v27  ;;  %2000 = vmax.xlane.f32.xlu0 %v1999_v28  ;;  %v1969_v44 = vadd.f32 %v1961_v31, %v4745_v42  ;;  %v1956_v33 = vsel %vm1018_vm4, %v1948_v20, %v1892_v14  ;;  %v1928_v17 = vrot.slane %v1818_v47, %v4580_v24  ;;  %v2002_v42 = vsel %vm1995_vm6, %v1989_v18, -inf }
 0x34b   : >> { %v2005_v35 = vsel %vm1995_vm6, %v1990_v29, -inf  ;;  %v1964_v25 = vsel %vm1027_vm5, %v1956_v33, %v1932_v21  ;;  %v1947_v38 = vsel %vm1009_vm3, %v1660_v26, %v4790_v53  ;;  %v1992_v46 = vadd.f32 %v4519_v1, %v1978_v30 }
 0x34c   : >> { %v1977_v62 = vmul.f32 0.35355338, %v1969_v44  ;;  %v1972_v36 = vadd.f32 %v1964_v25, %v4751_v39  ;;  %v1955_v40 = vsel %vm1018_vm4, %v1947_v38, %v1888_v34  ;;  %vm2819_vm3 = vcmask 195584  }
 0x34d   : >> { %v1963_v24 = vsel %vm1027_vm5, %v1955_v40, %v1928_v17  ;;  %v2011_v26 = vsel %vm1995_vm6, %v1992_v46, -inf  ;;  %v839_v17 = vld [vmem:[%s4912_s15] sm:$0xf] }
 0x34e   : >> { %2006 = vmax.xlane.f32.xlu1 %v2005_v35  ;;  %2003 = vmax.xlane.f32.xlu0 %v2002_v42  ;;  %v1991_v47 = vadd.f32 %v4519_v1, %v1977_v62  ;;  %v1980_v49 = vmul.f32 0.35355338, %v1972_v36  ;;  %v1971_v15 = vadd.f32 %v1963_v24, %v4749_v37  ;;  %v840_v35 = vld [vmem:[%s4912_s15 + $0x4] sm:$0xf]  ;;  %v2097_v25 = vsel %vm2095_vm7, %v839_v17, 0 }
 0x34f   : >> { %v2143_v38 = vsel %vm2095_vm7, %v840_v35, 0  ;;  %3559 = vmatpush3.bf16.msra.mxu1 %v2097_v25 }
 0x350   : >> { %v1979_v50 = vmul.f32 0.35355338, %v1971_v15  ;;  %v2008_v39 = vsel %vm1995_vm6, %v1991_v47, -inf  ;;  %v1994_v53 = vadd.f32 %v4519_v1, %v1980_v49  ;;  %3565 = vmatpush3.bf16.msra.mxu0 %v2143_v38  ;;  %3570 = vmatprep.subr.bf16.mxu1 %v4130_v2  ;;  %v841_v49 = vld [vmem:[%s4912_s15 + $0x8] sm:$0xf] }
 0x351   : >> { %3576 = vmatprep.subr.bf16.mxu0 %v4130_v2 }
 0x352   : >> { %2012 = vmax.xlane.f32.xlu1 %v2011_v26  ;;  %2009 = vmax.xlane.f32.xlu0 %v2008_v39  ;;  %v1993_v34 = vadd.f32 %v4519_v1, %v1979_v50  ;;  %v2017_v51 = vsel %vm1995_vm6, %v1994_v53, -inf  ;;  %v842_v26 = vld [vmem:[%s4912_s15 + $0xc] sm:$0xf] }
 0x354   : >> { %v2014_v54 = vsel %vm1995_vm6, %v1993_v34, -inf }
 0x356   : >> { %2018 = vmax.xlane.f32.xlu1 %v2017_v51  ;;  %2015 = vmax.xlane.f32.xlu0 %v2014_v54  ;;  %v2189_v51 = vsel %vm2095_vm7, %v841_v49, 0 }
 0x3d7   : >> { %v1998_v55 = vpop.xlane.xlu1 %1997  ;;  %v2001_v56 = vpop.xlane.xlu0 %2000 }
 0x3d8   : >> { %v2020_v37 = vsub.f32 %v1987_v52, %v1998_v55  ;;  %v2021_v57 = vsub.f32 %v1988_v19, %v2001_v56  ;;  %v2235_v55 = vsel %vm2095_vm7, %v842_v26, 0 }
 0x3da   : >> { %v2028_v58 = vmul.f32 1.442695, %v2020_v37  ;;  %v2030_v12 = vmul.f32 1.442695, %v2021_v57 }
 0x3db   : >> { %v2007_v59 = vpop.xlane.xlu1 %2006  ;;  %v2004_v60 = vpop.xlane.xlu0 %2003 }
 0x3dc   : >> { %3845 = vpow2.f32 %v2028_v58  ;;  %v2023_v61 = vsub.f32 %v1990_v29, %v2007_v59  ;;  %v2022_v5 = vsub.f32 %v1989_v18, %v2004_v60 }
 0x3dd   : >> { %3847 = vpow2.f32 %v2030_v12  ;;  %v843_v12 = vld [vmem:[%s4912_s15 + $0x10] sm:$0xf] }
 0x3de   : >> { %v2034_v6 = vmul.f32 1.442695, %v2023_v61  ;;  %v2032_v7 = vmul.f32 1.442695, %v2022_v5  ;;  %v844_v61 = vld [vmem:[%s4912_s15 + $0x14] sm:$0xf] }
 0x3df   : >> { %v2013_v8 = vpop.xlane.xlu1 %2012  ;;  %v2010_v63 = vpop.xlane.xlu0 %2009 }
 0x3e0   : >> { %3849 = vpow2.f32 %v2034_v6  ;;  %v2025_v3 = vsub.f32 %v1992_v46, %v2013_v8  ;;  %v2024_v4 = vsub.f32 %v1991_v47, %v2010_v63  ;;  %v2281_v8 = vsel %vm2095_vm7, %v843_v12, 0 }
 0x3e1   : >> { %3851 = vpow2.f32 %v2032_v7 }
 0x3e2   : >> { %v2038_v43 = vmul.f32 1.442695, %v2025_v3  ;;  %v2036_v9 = vmul.f32 1.442695, %v2024_v4 }
 0x3e3   : >> { %v2019_v23 = vpop.xlane.xlu1 %2018  ;;  %v2016_v10 = vpop.xlane.xlu0 %2015 }
 0x3e4   : >> { %3853 = vpow2.f32 %v2038_v43  ;;  %v2027_v22 = vsub.f32 %v1994_v53, %v2019_v23  ;;  %v2026_v11 = vsub.f32 %v1993_v34, %v2016_v10  ;;  %v2327_v43 = vsel %vm2095_vm7, %v844_v61, 0 }
 0x3e5   : >> { %3855 = vpow2.f32 %v2036_v9 }
 0x3e6   : >> { %v3846_v13 = vpop.eup %3845  ;;  %v2042_v41 = vmul.f32 1.442695, %v2027_v22  ;;  %v2040_v32 = vmul.f32 1.442695, %v2026_v11 }
 0x3e7   : >> { %v3848_v14 = vpop.eup %3847  ;;  %v2044_v52 = vsel %vm1995_vm6, %v3846_v13, 0.0 }
 0x3e8   : >> { %3857 = vpow2.f32 %v2042_v41  ;;  %2045 = vadd.xlane.f32.xlu0 %v2044_v52  ;;  %v2047_v19 = vsel %vm1995_vm6, %v3848_v14, 0.0  ;;  %v845_v41 = vld [vmem:[%s4912_s15 + $0x18] sm:$0xf] }
 0x3e9   : >> { %3859 = vpow2.f32 %v2040_v32  ;;  %2048 = vadd.xlane.f32.xlu1 %v2047_v19 }
 0x3ea   : >> { %v4886_v16 = vpop.eup %3849 }
 0x3eb   : >> { %v4888_v45 = vpop.eup %3851  ;;  %v2053_v31 = vsel %vm1995_vm6, %v4886_v16, 0.0 }
 0x3ec   : >> { %v2050_v18 = vsel %vm1995_vm6, %v4888_v45, 0.0 }
 0x3ed   : >> { %2051 = vadd.xlane.f32.xlu0 %v2050_v18  ;;  %2054 = vadd.xlane.f32.xlu1 %v2053_v31 }
 0x3ee   : >> { %v4894_v21 = vpop.eup %3853 }
 0x3ef   : >> { %v4896_v20 = vpop.eup %3855  ;;  %v2059_v28 = vsel %vm1995_vm6, %v4894_v21, 0.0 }
 0x3f0   : >> { %v2056_v27 = vsel %vm1995_vm6, %v4896_v20, 0.0 }
 0x3f1   : >> { %2057 = vadd.xlane.f32.xlu0 %v2056_v27  ;;  %2060 = vadd.xlane.f32.xlu1 %v2059_v28 }
 0x3f2   : >> { %v4902_v29 = vpop.eup %3857 }
 0x3f3   : >> { %v4904_v30 = vpop.eup %3859  ;;  %v2065_v33 = vsel %vm1995_vm6, %v4902_v29, 0.0 }
 0x3f4   : >> { %v2062_v44 = vsel %vm1995_vm6, %v4904_v30, 0.0 }
 0x3f5   : >> { %2063 = vadd.xlane.f32.xlu0 %v2062_v44  ;;  %2066 = vadd.xlane.f32.xlu1 %v2065_v33 }
 0x406   : >> { %2585 = vrot.lane.b32.xlu1 %v4632_v48, %s4140_s11  ;;  %s2828_s11 = scalar_lea.vmem %s5227_s7, %s4121_s28 }
 0x40a   : >> { %2663 = vrot.lane.b32.xlu1 %v4632_v48, %s4141_s9 }
 0x40b   : >> { %2499 = vrot.lane.b32.xlu0 %v4632_v48, %s4142_s29  ;;  %s2892_s29 = scalar_lea.vmem %s5228_s8, %s4121_s28 }
 0x40f   : >> { %2741 = vrot.lane.b32.xlu0 %v4632_v48, %s4143_s4 }
 0x475   : >> { %v2046_v62 = vpop.xlane.xlu0 %2045 }
 0x476   : >> { %3861 = vrcp.f32 %v2046_v62  ;;  %v2049_v36 = vpop.xlane.xlu1 %2048 }
 0x477   : >> { %3863 = vrcp.f32 %v2049_v36 }
 0x47a   : >> { %v2052_v40 = vpop.xlane.xlu0 %2051  ;;  %v2055_v42 = vpop.xlane.xlu1 %2054 }
 0x47b   : >> { %3865 = vrcp.f32 %v2052_v40 }
 0x47c   : >> { %3867 = vrcp.f32 %v2055_v42 }
 0x47e   : >> { %v2058_v46 = vpop.xlane.xlu0 %2057  ;;  %v2061_v24 = vpop.xlane.xlu1 %2060 }
 0x47f   : >> { %3869 = vrcp.f32 %v2058_v46 }
 0x480   : >> { %v3862_v47 = vpop.eup %3861  ;;  %3871 = vrcp.f32 %v2061_v24 }
 0x481   : >> { %v3864_v15 = vpop.eup %3863  ;;  %v2076_v50 = vmul.f32 %v3862_v47, %v3846_v13 }
 0x482   : >> { %v2077_v39 = vmul.f32 %v3864_v15, %v3848_v14  ;;  %v2064_v48 = vpop.xlane.xlu0 %2063  ;;  %v2067_v53 = vpop.xlane.xlu1 %2066 }
 0x483   : >> { %3873 = vrcp.f32 %v2064_v48  ;;  %v2084_v34 = vpack.c.bf16 %v2076_v50, %v2076_v50 }
 0x484   : >> { %3875 = vrcp.f32 %v2067_v53  ;;  %v2085_v54 = vpack.c.bf16 %v2077_v39, %v2077_v39 }
 0x485   : >> { %v3866_v56 = vpop.eup %3865  ;;  %3561 = vmatmul.mubr.msk.bf16.vlgmr.msra.gmra.mrb[24].mxu1 %vm1044_vm2, %v2084_v34  ;;  %v4940_v7 = vunpack.c.l.b16 %v2084_v34 }
 0x486   : >> { %v3868_v37 = vpop.eup %3867  ;;  %v2078_v57 = vmul.f32 %v3866_v56, %v4888_v45  ;;  %3571 = vmatpush3.bf16.msra.mxu1 %v2189_v51  ;;  %3567 = vmatmul.mubr.msk.bf16.vlgmr.msra.gmra.mrb[28].mxu0 %vm1044_vm2, %v2085_v54  ;;  %v4944_v3 = vunpack.c.l.b16 %v2085_v54  ;;  %v2500_v24 = vpop.permute.xlu0 %2499 }
 0x487   : >> { %3577 = vmatpush3.bf16.msra.mxu0 %v2235_v55  ;;  %3572 = vmatprep.mubr.msk.bf16.mxu1 %vm4131_vm0, %v4130_v2  ;;  %v2079_v58 = vmul.f32 %v3868_v37, %v4886_v16  ;;  %v2570_v13 = vrot.slane %v4940_v7, 1  ;;  %v846_v16 = vld [vmem:[%s4912_s15 + $0x1c] sm:$0xf]  ;;  %v2648_v36 = vrot.slane %v4940_v7, 2  ;;  %v2726_v55 = vrot.slane %v4940_v7, 3  ;;  %v2586_v37 = vpop.permute.xlu1 %2585  ;;  %s5294_s15 = sld [smem:[#allocation28_spill]] }
 0x488   : >> { %3582 = vmatprep.subr.bf16.mxu1 %v4130_v2  ;;  %3578 = vmatprep.mubr.msk.bf16.mxu0 %vm4131_vm0, %v4130_v2  ;;  %v2086_v60 = vpack.c.bf16 %v2078_v57, %v2078_v57  ;;  %v2477_v14 = vrot.slane %v4944_v3, 7  ;;  %v2649_v28 = vrot.slane %v4944_v3, 1  ;;  %v2727_v46 = vrot.slane %v4944_v3, 2 }
 0x489   : >> { %v3870_v59 = vpop.eup %3869  ;;  %3588 = vmatprep.subr.bf16.mxu0 %v4130_v2  ;;  %v2087_v4 = vpack.c.bf16 %v2079_v58, %v2079_v58  ;;  %v2571_v27 = vsel %vm2478_vm8, %v4944_v3, %v2570_v13  ;;  %v2528_v56 = vsel %vm2095_vm7, %v2500_v24, 0 }
 0x48a   : >> { %v3872_v5 = vpop.eup %3871  ;;  %v2080_v6 = vmul.f32 %v3870_v59, %v4896_v20  ;;  %v4948_v23 = vunpack.c.l.b16 %v2086_v60  ;;  %v2373_v20 = vsel %vm2095_vm7, %v845_v41, 0  ;;  %v2479_v17 = vsel %vm2478_vm8, %v2477_v14, %v4940_v7 }
 0x48b   : >> { %v2081_v63 = vmul.f32 %v3872_v5, %v4894_v21  ;;  %v4958_v52 = vunpack.c.l.b16 %v2087_v4  ;;  %v2650_v47 = vsel %vm2478_vm8, %v2649_v28, %v2648_v36  ;;  %v2728_v7 = vsel %vm2478_vm8, %v2727_v46, %v2726_v55 }
 0x48c   : >> { %v2088_v10 = vpack.c.bf16 %v2080_v6, %v2080_v6  ;;  %v2480_v45 = vrot.slane %v4948_v23, 6  ;;  %v2572_v21 = vrot.slane %v4948_v23, 7  ;;  %v2729_v34 = vrot.slane %v4948_v23, 1 }
 0x48d   : >> { %v3874_v9 = vpop.eup %3873  ;;  %3573 = vmatmul.mubr.msk.bf16.vlgmr.msra.gmra.mrb[28].mxu1 %vm1044_vm2, %v2086_v60  ;;  %v2089_v19 = vpack.c.bf16 %v2081_v63, %v2081_v63  ;;  %v2574_v35 = vrot.slane %v4958_v52, 6  ;;  %v2652_v57 = vrot.slane %v4958_v52, 7  ;;  %v2651_v58 = vsel %vm2481_vm9, %v4948_v23, %v2650_v47  ;;  %s3014_s9 = scalar_lea.vmem %s5294_s15, %s4121_s28 }
 0x48e   : >> { %v3876_v22 = vpop.eup %3875  ;;  %v2082_v11 = vmul.f32 %v3874_v9, %v4904_v30  ;;  %3583 = vmatpush3.bf16.msra.mxu1 %v2281_v8  ;;  %3579 = vmatmul.mubr.msk.bf16.vlgmr.msra.gmra.mrb[32].mxu0 %vm1044_vm2, %v2087_v4  ;;  %v4965_v18 = vunpack.c.l.b16 %v2088_v10  ;;  %v2483_v30 = vrot.slane %v4958_v52, 5  ;;  %v2482_v62 = vsel %vm2481_vm9, %v2480_v45, %v2479_v17 }
 0x48f   : >> { %3589 = vmatpush3.bf16.msra.mxu0 %v2327_v43  ;;  %3584 = vmatprep.mubr.msk.bf16.mxu1 %vm4131_vm0, %v4130_v2  ;;  %v2083_v32 = vmul.f32 %v3876_v22, %v4902_v29  ;;  %v2419_v29 = vsel %vm2095_vm7, %v846_v16, 0  ;;  %v4975_v44 = vunpack.c.l.b16 %v2089_v19  ;;  %v2573_v42 = vsel %vm2481_vm9, %v2572_v21, %v2571_v27  ;;  %v2742_v16 = vpop.permute.xlu0 %2741 }
 0x490   : >> { %3594 = vmatprep.subr.bf16.mxu1 %v4130_v2  ;;  %3590 = vmatprep.mubr.msk.bf16.mxu0 %vm4131_vm0, %v4130_v2  ;;  %v2090_v31 = vpack.c.bf16 %v2082_v11, %v2082_v11  ;;  %v2486_v25 = vrot.slane %v4965_v18, 4  ;;  %v2576_v40 = vrot.slane %v4965_v18, 5  ;;  %v2485_v15 = vsel %vm2484_vm10, %v2483_v30, %v2482_v62 }
 0x491   : >> { %3600 = vmatprep.subr.bf16.mxu0 %v4130_v2  ;;  %v2091_v33 = vpack.c.bf16 %v2083_v32, %v2083_v32  ;;  %v2489_v50 = vrot.slane %v4975_v44, 3  ;;  %v2575_v48 = vsel %vm2484_vm10, %v2574_v35, %v2573_v42  ;;  %v2578_v53 = vrot.slane %v4975_v44, 4  ;;  %v2664_v32 = vpop.permute.xlu1 %2663 }
 0x492   : >> { %v4982_v38 = vunpack.c.l.b16 %v2090_v31  ;;  %v2488_v26 = vsel %vm2487_vm11, %v2486_v25, %v2485_v15  ;;  %v2577_v51 = vsel %vm2487_vm11, %v2576_v40, %v2575_v48  ;;  %v2654_v12 = vrot.slane %v4965_v18, 6 }
 0x493   : >> { %v4996_v49 = vunpack.c.l.b16 %v2091_v33  ;;  %v2491_v59 = vsel %vm2490_vm12, %v2489_v50, %v2488_v26  ;;  %v2579_v5 = vsel %vm2490_vm12, %v2578_v53, %v2577_v51  ;;  %v2606_v8 = vsel %vm2095_vm7, %v2586_v37, 0 }
 0x494   : >> { %v2492_v39 = vrot.slane %v4982_v38, 2  ;;  %v2580_v54 = vrot.slane %v4982_v38, 3  ;;  %v2732_v63 = vrot.slane %v4965_v18, 7  ;;  %v2730_v4 = vsel %vm2481_vm9, %v2729_v34, %v2728_v7 }
 0x495   : >> { %3585 = vmatmul.mubr.msk.bf16.vlgmr.msra.gmra.mrb[32].mxu1 %vm1044_vm2, %v2088_v10  ;;  %v2495_v60 = vrot.slane %v4996_v49, 1  ;;  %v2582_v6 = vrot.slane %v4996_v49, 2  ;;  %v2653_v43 = vsel %vm2484_vm10, %v2652_v57, %v2651_v58  ;;  %v2656_v10 = vrot.slane %v4975_v44, 5 }
 0x496   : >> { %3595 = vmatpush3.bf16.msra.mxu1 %v2373_v20  ;;  %3591 = vmatmul.mubr.msk.bf16.vlgmr.msra.gmra.mrb[36].mxu0 %vm1044_vm2, %v2089_v19  ;;  %v2494_v61 = vsel %vm2493_vm13, %v2492_v39, %v2491_v59  ;;  %v2581_v3 = vsel %vm2493_vm13, %v2580_v54, %v2579_v5  ;;  %v2655_v23 = vsel %vm2487_vm11, %v2654_v12, %v2653_v43  ;;  %v2658_v11 = vrot.slane %v4982_v38, 4 }
 0x497   : >> { %3601 = vmatpush3.bf16.msra.mxu0 %v2419_v29  ;;  %3596 = vmatprep.mubr.msk.bf16.mxu1 %vm4131_vm0, %v4130_v2  ;;  %v2497_v9 = vsel %vm2496_vm14, %v2495_v60, %v2494_v61  ;;  %v2583_v22 = vsel %vm2496_vm14, %v2582_v6, %v2581_v3  ;;  %v2731_v13 = vsel %vm2484_vm10, %v4958_v52, %v2730_v4  ;;  %v2734_v41 = vrot.slane %v4975_v44, 6 }
 0x498   : >> { %3606 = vmatprep.subr.bf16.mxu1 %v4130_v2  ;;  %3602 = vmatprep.mubr.msk.bf16.mxu0 %vm4131_vm0, %v4130_v2  ;;  %v2733_v14 = vsel %vm2487_vm11, %v2732_v63, %v2731_v13  ;;  %v2736_v19 = vrot.slane %v4982_v38, 5  ;;  %v2498_v45 = vpack.c.b16 %v2497_v9, %v2497_v9  ;;  %v2584_v18 = vpack.c.b16 %v2583_v22, %v2583_v22 }
 0x499   : >> { %3612 = vmatprep.subr.bf16.mxu0 %v4130_v2  ;;  %v2660_v21 = vrot.slane %v4996_v49, 3  ;;  %v2684_v20 = vsel %vm2095_vm7, %v2664_v32, 0  ;;  %v2735_v27 = vsel %vm2490_vm12, %v2734_v41, %v2733_v14  ;;  %v2738_v28 = vrot.slane %v4996_v49, 4 }
 0x49a   : >> { %v2762_v29 = vsel %vm2095_vm7, %v2742_v16, 0  ;;  %v2737_v30 = vsel %vm2493_vm13, %v2736_v19, %v2735_v27 }
 0x49d   : >> { %3597 = vmatmul.mubr.msk.bf16.vlgmr.msra.gmra.mrb[36].mxu1 %vm1044_vm2, %v2090_v31  ;;  %v2657_v31 = vsel %vm2490_vm12, %v2656_v10, %v2655_v23 }
 0x49e   : >> { %3607 = vmatpush3.bf16.msra.mxu1 %v2528_v56  ;;  %3603 = vmatmul.mubr.msk.bf16.vlgmr.msra.gmra.mrb[40].mxu0 %vm1044_vm2, %v2091_v33  ;;  %v2659_v52 = vsel %vm2493_vm13, %v2658_v11, %v2657_v31  ;;  %v2739_v33 = vsel %vm2496_vm14, %v2738_v28, %v2737_v30 }
 0x49f   : >> { %3613 = vmatpush3.bf16.msra.mxu0 %v2606_v8  ;;  %3608 = vmatprep.mubr.msk.bf16.mxu1 %vm4131_vm0, %v4130_v2  ;;  %v2661_v44 = vsel %vm2496_vm14, %v2660_v21, %v2659_v52  ;;  %v2740_v35 = vpack.c.b16 %v2739_v33, %v2739_v33 }
 0x4a0   : >> { %3618 = vmatprep.subr.bf16.mxu1 %v4130_v2  ;;  %3614 = vmatprep.mubr.msk.bf16.mxu0 %vm4131_vm0, %v4130_v2  ;;  %v2662_v17 = vpack.c.b16 %v2661_v44, %v2661_v44 }
 0x4a1   : >> { %3624 = vmatprep.subr.bf16.mxu0 %v4130_v2 }
 0x4a5   : >> { %3609 = vmatmul.mubr.msk.bf16.vlgmr.msra.gmra.mrb[40].mxu1 %vm1044_vm2, %v2498_v45 }
 0x4a6   : >> { %3619 = vmatpush3.bf16.msra.mxu1 %v2684_v20  ;;  %3615 = vmatmul.mubr.msk.bf16.vlgmr.msra.gmra.mrb[44].mxu0 %vm1044_vm2, %v2584_v18 }
 0x4a7   : >> { %3625 = vmatpush3.bf16.msra.mxu0 %v2762_v29  ;;  %3620 = vmatprep.mubr.msk.bf16.mxu1 %vm4131_vm0, %v4130_v2 }
 0x4a8   : >> { %3626 = vmatprep.mubr.msk.bf16.mxu0 %vm4131_vm0, %v4130_v2  ;;  %3630 = vmatprep.subr.bf16.mxu1 %v4130_v2 }
 0x4a9   : >> { %3638 = vmatprep.subr.bf16.mxu0 %v4130_v2 }
 0x4ad   : >> { %3621 = vmatmul.mubr.msk.bf16.vlgmr.msra.gmra.mrb[44].mxu1 %vm1044_vm2, %v2662_v17 }
 0x4ae   : >> { %3627 = vmatmul.mubr.msk.bf16.vlgmr.msra.gmra.mrb[48].mxu0 %vm1044_vm2, %v2740_v35  ;;  %3634 = vmatprep.mubr.msk.bf16.mxu1 %vm4131_vm0, %v4130_v2 }
 0x4af   : >> { %3642 = vmatprep.mubr.msk.bf16.mxu0 %vm4131_vm0, %v4130_v2 }
 0x558   : >> { %v2133_v25 = vpop.f32.mrb[24].mxu1 }
 0x559   : >> { %v2587_v38 = vrot.slane %v2133_v25, 1  ;;  %v2665_v62 = vrot.slane %v2133_v25, 2  ;;  %v3562_v36 = vpop.f32.mrb[25].mxu1  ;;  %v2179_v40 = vpop.f32.mrb[28].mxu0  ;;  %v2743_v42 = vrot.slane %v2133_v25, 3 }
 0x55a   : >> { %v2136_v46 = vpop.f32.mrb[26].mxu1  ;;  %v2509_v24 = vrot.slane %v2179_v40, 7  ;;  %v2666_v47 = vrot.slane %v2179_v40, 1  ;;  %v2744_v49 = vrot.slane %v2179_v40, 2  ;;  %v3568_v15 = vpop.f32.mrb[29].mxu0  ;;  %v3837_v36 = vld [vmem:[%s2823_s27] sm:$0xff]  }
 0x55b   : >> { %v2588_v50 = vsel %vm2478_vm8, %v2179_v40, %v2587_v38  ;;  %v3563_v26 = vpop.f32.mrb[27].mxu1  ;;  %v2182_v39 = vpop.f32.mrb[30].mxu0  ;;  %3631 = vmatpush3.bf16.msra.mxu1 %v3837_v36 }
 0x55c   : >> { %v2510_v48 = vsel %vm2478_vm8, %v2509_v24, %v2133_v25  ;;  %v3569_v53 = vpop.f32.mrb[31].mxu0  ;;  %v2667_v34 = vsel %vm2478_vm8, %v2666_v47, %v2665_v62  ;;  %v2745_v51 = vsel %vm2478_vm8, %v2744_v49, %v2743_v42  ;;  %3632 = vmatprep.subr.bf16.mxu1 %v4130_v2 }
 0x560   : >> { %v2225_v54 = vpop.f32.mrb[28].mxu1 }
 0x561   : >> { %v2511_v55 = vrot.slane %v2225_v54, 6  ;;  %v2589_v56 = vrot.slane %v2225_v54, 7  ;;  %v2668_v37 = vsel %vm2481_vm9, %v2225_v54, %v2667_v34  ;;  %v2746_v57 = vrot.slane %v2225_v54, 1  ;;  %v3574_v58 = vpop.f32.mrb[29].mxu1  ;;  %v2271_v12 = vpop.f32.mrb[32].mxu0 }
 0x562   : >> { %v2228_v59 = vpop.f32.mrb[30].mxu1  ;;  %v2513_v60 = vrot.slane %v2271_v12, 5  ;;  %v2591_v61 = vrot.slane %v2271_v12, 6  ;;  %v2669_v5 = vrot.slane %v2271_v12, 7  ;;  %v3580_v6 = vpop.f32.mrb[33].mxu0 }
 0x563   : >> { %v2512_v7 = vsel %vm2481_vm9, %v2511_v55, %v2510_v48  ;;  %v2590_v8 = vsel %vm2481_vm9, %v2589_v56, %v2588_v50  ;;  %v2747_v63 = vsel %vm2481_vm9, %v2746_v57, %v2745_v51  ;;  %v3575_v3 = vpop.f32.mrb[31].mxu1  ;;  %v2274_v4 = vpop.f32.mrb[34].mxu0 }
 0x564   : >> { %v2514_v43 = vsel %vm2484_vm10, %v2513_v60, %v2512_v7  ;;  %v2592_v9 = vsel %vm2484_vm10, %v2591_v61, %v2590_v8  ;;  %v2670_v23 = vsel %vm2484_vm10, %v2669_v5, %v2668_v37  ;;  %v2748_v10 = vsel %vm2484_vm10, %v2271_v12, %v2747_v63  ;;  %v3581_v22 = vpop.f32.mrb[35].mxu0  ;;  %v3838_v5 = vld [vmem:[%s2823_s27 + $0x8] sm:$0xff]   ;;  %s4145_s27 = smov 16  }
 0x565   : >> { %3633 = vmatpush3.bf16.msra.mxu1 %v3838_v5 }
 0x566   : >> { %3646 = vmatprep.subr.bf16.mxu1 %v4130_v2 }
 0x568   : >> { %v2317_v11 = vpop.f32.mrb[32].mxu1 }
 0x569   : >> { %v2515_v13 = vrot.slane %v2317_v11, 4  ;;  %v2593_v41 = vrot.slane %v2317_v11, 5  ;;  %v2671_v32 = vrot.slane %v2317_v11, 6  ;;  %v2749_v14 = vrot.slane %v2317_v11, 7  ;;  %v3586_v19 = vpop.f32.mrb[33].mxu1  ;;  %v2363_v16 = vpop.f32.mrb[36].mxu0 }
 0x56a   : >> { %v2320_v45 = vpop.f32.mrb[34].mxu1  ;;  %v2517_v18 = vrot.slane %v2363_v16, 3  ;;  %v2595_v31 = vrot.slane %v2363_v16, 4  ;;  %v2673_v21 = vrot.slane %v2363_v16, 5  ;;  %v2751_v20 = vrot.slane %v2363_v16, 6  ;;  %v3592_v52 = vpop.f32.mrb[37].mxu0 }
 0x56b   : >> { %v3587_v27 = vpop.f32.mrb[35].mxu1  ;;  %v2366_v28 = vpop.f32.mrb[38].mxu0  ;;  %v2516_v29 = vsel %vm2487_vm11, %v2515_v13, %v2514_v43  ;;  %v2594_v30 = vsel %vm2487_vm11, %v2593_v41, %v2592_v9  ;;  %v2672_v44 = vsel %vm2487_vm11, %v2671_v32, %v2670_v23  ;;  %v2750_v33 = vsel %vm2487_vm11, %v2749_v14, %v2748_v10 }
 0x56c   : >> { %v3593_v17 = vpop.f32.mrb[39].mxu0  ;;  %v2518_v35 = vsel %vm2490_vm12, %v2517_v18, %v2516_v29  ;;  %v2596_v25 = vsel %vm2490_vm12, %v2595_v31, %v2594_v30  ;;  %v2674_v38 = vsel %vm2490_vm12, %v2673_v21, %v2672_v44  ;;  %v2752_v62 = vsel %vm2490_vm12, %v2751_v20, %v2750_v33  ;;  %v3387_v30 = vld [vmem:[%s2828_s11] ss:$0 sm:$0xff] }
 0x570   : >> { %v2409_v40 = vpop.f32.mrb[36].mxu1 }
 0x571   : >> { %v2519_v42 = vrot.slane %v2409_v40, 2  ;;  %v2597_v46 = vrot.slane %v2409_v40, 3  ;;  %v2675_v24 = vrot.slane %v2409_v40, 4  ;;  %v2753_v47 = vrot.slane %v2409_v40, 5  ;;  %v3598_v49 = vpop.f32.mrb[37].mxu1  ;;  %v2455_v15 = vpop.f32.mrb[40].mxu0 }
 0x572   : >> { %v2412_v50 = vpop.f32.mrb[38].mxu1  ;;  %v2521_v26 = vrot.slane %v2455_v15, 1  ;;  %v2599_v39 = vrot.slane %v2455_v15, 2  ;;  %v2677_v48 = vrot.slane %v2455_v15, 3  ;;  %v2755_v53 = vrot.slane %v2455_v15, 4  ;;  %v3604_v34 = vpop.f32.mrb[41].mxu0 }
 0x573   : >> { %v3599_v51 = vpop.f32.mrb[39].mxu1  ;;  %v2458_v54 = vpop.f32.mrb[42].mxu0  ;;  %v2520_v55 = vsel %vm2493_vm13, %v2519_v42, %v2518_v35  ;;  %v2598_v56 = vsel %vm2493_vm13, %v2597_v46, %v2596_v25  ;;  %v2676_v37 = vsel %vm2493_vm13, %v2675_v24, %v2674_v38  ;;  %v2754_v57 = vsel %vm2493_vm13, %v2753_v47, %v2752_v62  ;;  %v3839_v47 = vld [vmem:[%s2926_s3] sm:$0xff]   ;;  %v3840_v49 = vld [vmem:[%s2926_s3 + $0x8] sm:$0xff]   ;;  %s5296_s3 = sld [smem:[#allocation30_spill]] }
 0x574   : >> { %v3605_v58 = vpop.f32.mrb[43].mxu0  ;;  %v2522_v12 = vsel %vm2496_vm14, %v2521_v26, %v2520_v55  ;;  %v2600_v59 = vsel %vm2496_vm14, %v2599_v39, %v2598_v56  ;;  %v2678_v60 = vsel %vm2496_vm14, %v2677_v48, %v2676_v37  ;;  %v2756_v61 = vsel %vm2496_vm14, %v2755_v53, %v2754_v57  ;;  %3639 = vmatpush3.bf16.msra.mxu0 %v3839_v47  ;;  %v3391_v39 = vld [vmem:[%s2892_s29] ss:$0 sm:$0xff]  ;;  %v3842_v56 = vld [vmem:[%s4576_s26 + $0x8] sm:$0xff]   ;;  %v3843_v37 = vld [vmem:[%s4576_s26 + $0x10] sm:$0xff]  }
 0x575   : >> { %3640 = vmatprep.subr.bf16.mxu0 %v4130_v2  ;;  %v3841_v55 = vld [vmem:[%s4576_s26] sm:$0xff]   ;;  %v3844_v57 = vld [vmem:[%s4576_s26 + $0x18] sm:$0xff]  }
 0x576   : >> { %v3394_v58 = vld [vmem:[%s2931_s17] ss:$0 sm:$0xff] }
 0x578   : >> { %v2564_v6 = vpop.f32.mrb[40].mxu1  ;;  %3641 = vmatpush3.bf16.msra.mxu0 %v3840_v49 }
 0x579   : >> { %v2565_v7 = vadd.f32 %v2564_v6, %v2522_v12  ;;  %v3610_v8 = vpop.f32.mrb[41].mxu1  ;;  %v2642_v63 = vpop.f32.mrb[44].mxu0  ;;  %s3093_s16 = scalar_lea.vmem %s5296_s3, %s4121_s28 }
 0x57a   : >> { %v2567_v3 = vpop.f32.mrb[42].mxu1  ;;  %v2643_v4 = vadd.f32 %v2642_v63, %v2600_v59  ;;  %v3616_v43 = vpop.f32.mrb[45].mxu0 }
 0x57b   : >> { %v3611_v9 = vpop.f32.mrb[43].mxu1  ;;  %v2645_v23 = vpop.f32.mrb[46].mxu0 }
 0x57c   : >> { %2805 = vrot.lane.b32.xlu1 %v2643_v4, %s4144_s6  ;;  %v3617_v10 = vpop.f32.mrb[47].mxu0  ;;  %s5295_s6 = sld [smem:[#allocation29_spill]] }
 0x57d   : >> { %v3399_v10 = vld [vmem:[%s3014_s9] ss:$0 sm:$0xff] }
 0x580   : >> { %v2720_v22 = vpop.f32.mrb[44].mxu1 }
 0x581   : >> { %v2721_v11 = vadd.f32 %v2720_v22, %v2678_v60  ;;  %v3622_v13 = vpop.f32.mrb[45].mxu1  ;;  %v2798_v41 = vpop.f32.mrb[48].mxu0 }
 0x582   : >> { %v2723_v32 = vpop.f32.mrb[46].mxu1  ;;  %v2799_v14 = vadd.f32 %v2798_v41, %v2756_v61  ;;  %v3628_v19 = vpop.f32.mrb[49].mxu0 }
 0x583   : >> { %v3623_v16 = vpop.f32.mrb[47].mxu1  ;;  %2809 = vrot.lane.b32.xlu0 %v2721_v11, %s4145_s27  ;;  %v2801_v45 = vpop.f32.mrb[50].mxu0  ;;  %s5292_s27 = sld [smem:[#allocation25_spill]] }
 0x584   : >> { %2813 = vrot.lane.b32.xlu1 %v2799_v14, %s4146_s10  ;;  %v3629_v18 = vpop.f32.mrb[51].mxu0 }
 0x589   : >> { %s2894_s10 = scalar_lea.vmem %s5292_s27, %s4121_s28  ;;  %s3091_s27 = scalar_lea.vmem %s5295_s6, %s4121_s28 }
 0x58a   : >> { %v3392_v53 = vld [vmem:[%s2894_s10] ss:$0 sm:$0xff]  ;;  %s752_s28 = sadd.s32 1, %s4121_s28  }
 0x58b   : >> { %p749_p1 = scmp.ge.s32.totalorder %s752_s28, 5  }
 0x58c   : > { %s5298_s11 = sld [smem:[#allocation31_spill]] (%p749_p1)  ;;  %s5299_s9 = sld [smem:[#allocation32_spill]] (%p749_p1) }
 0x58d   : > { %s5300_s6 = scalar_lea.vmem (%p749_p1), %s5238_s18, %s4509_s0  ;;  %s3407_s10 = sshll.u32 (%p749_p1), %s4274_s2, 4 }
 0x58e   : > { %s5303_s26 = sld [smem:[#allocation33_spill]] (%p749_p1)  ;;  %s3150_s28 = scalar_lea.sflag (%p749_p1), [#allocation4], %s4485_s19 }
 0x58f   : > { %p5304_p4 = scmp.ne.s32.totalorder (%p749_p1), %s5279_s1, 0 }
 0x592   : > { %v3137_v49 = vld [vmem:[%s5299_s9] sm:$0x1] (%p749_p1)  ;;  %s4147_s9 = smov (%p749_p1), [#allocation11]  }
 0x593   : > { %s4031_s29 = sshll.u32 (%p749_p1), %s4147_s9, 4  ;;  %s4032_s29 = int_to_ptr.vmem [resolvable:$false] %s4031_s29 }
 0x594   : > { %s4033_s4 = scalar_lea.vmem (%p749_p1), %s4032_s29, 32 }
 0x5ee   : >> { %v2806_v31 = vpop.permute.xlu1 %2805 }
 0x5ef   : >> { %v2816_v21 = vsel %vm1044_vm2, %v2565_v7, %v2806_v31 }
 0x5f5   : >> { %v2810_v20 = vpop.permute.xlu0 %2809 }
 0x5f6   : >> { %v2818_v52 = vsel %vm2817_vm15, %v2816_v21, %v2810_v20  ;;  %v2814_v27 = vpop.permute.xlu1 %2813 }
 0x5f7   : >> { %v2820_v28 = vsel %vm2819_vm3, %v2818_v52, %v2814_v27 }
 0x5f8   : >> { %v2821_v29 = vpack.c.bf16 %v2820_v28, %v2820_v28 }
 0x5fa   : >> { %3635 = vmatmul.mubr.msk.bf16.vlgmr.msra.gmra.mrb[48].mxu1 %vm782_vm1, %v2821_v29  ;;  %v3405_v29 = vld [vmem:[%s3091_s27] ss:$0 sm:$0xff]  ;;  %s5301_s27 = scalar_lea.vmem (%p749_p1), [#allocation11], %s4485_s19 }
 0x5fb   : >> { %3654 = vmatprep.mubr.msk.bf16.mxu1 %vm4131_vm0, %v4130_v2  ;;  %3647 = vmatpush3.bf16.msra.mxu1 %v3841_v55  ;;  %vm3046_vm0 = vcmask 523264   ;;  %s5302_s21 = smov (%p749_p1), %s5301_s27 }
 0x5fc   : >> { %3648 = vmatprep.subr.bf16.mxu1 %v4130_v2  ;;  %s3165_s3 = sshll.u32 (%p749_p1), %s5302_s21, 4  ;;  %s3166_s3 = int_to_ptr.vmem [resolvable:$true] %s3165_s3 }
 0x5fd   : > { %s4027_s15 = scalar_lea.vmem (%p749_p1), %s3166_s3, 16  ;;  %p4034_p6 = scmp.lt.s32.totalorder (%p749_p1), %s3166_s3, %s4032_s29 }
 0x5fe   : > { %p4028_p2 = scmp.ne.s32.totalorder (%p749_p1), %s3166_s3, %s4027_s15  ;;  %p4035_p10 = scmp.lt.s32.totalorder (%p749_p1), %s4033_s4, %s4027_s15 }
 0x5ff   : >> { %3649 = vmatpush3.bf16.msra.mxu1 %v3842_v56 }
 0x600   : >> { %3650 = vmatprep.subr.bf16.mxu1 %v4130_v2  ;;  %p4029_p0 = pnand (%p749_p1), %p4028_p2, %p5304_p4  ;;  %p4036_p13 = por (%p749_p1), %p4035_p10, %p4034_p6 }
 0x602   : > { %p4030_p8 = pneg (%p749_p1), %p4029_p0 }
 0x603   : >> { %3651 = vmatpush3.bf16.msra.mxu1 %v3843_v37 }
 0x604   : >> { %3652 = vmatprep.subr.bf16.mxu1 %v4130_v2  ;;  %p4037_p9 = pnand (%p749_p1), %p4036_p13, %p4030_p8 }
 0x607   : >> { %3653 = vmatpush3.bf16.msra.mxu1 %v3844_v57 }
 0x6cd   : >> { %v2885_v44 = vpop.f32.mrb[48].mxu1 }
 0x6ce   : >> { %v2886_v33 = vadd.f32 %v3387_v30, %v2885_v44  ;;  %v3636_v17 = vpop.f32.mrb[49].mxu1  ;;  %v3406_v44 = vld [vmem:[%s3093_s16] ss:$0 sm:$0xff] }
 0x6cf   : >> { %v2888_v35 = vpop.f32.mrb[50].mxu1 }
 0x6d0   : >> { %v3637_v25 = vpop.f32.mrb[51].mxu1  ;;  %v2891_v38 = vadd.f32 %v4117_v0, %v2886_v33 }
 0x6d1   : > { %v3127_v25 = vld [vmem:[%s5298_s11] sm:$0xff] (%p749_p1)  ;;  %s5177_s11 = scalar_lea.hbm (%p749_p1), %s5303_s26, %s3407_s10 }
 0x6d2   : >> { %v2896_v62 = vsel %vm782_vm1, %v2891_v38, 0.0 }
 0x6d3   : >> { %2897 = vadd.xlane.f32.xlu0 %v2896_v62 }
 0x760   : >> { %v2898_v36 = vpop.xlane.xlu0 %2897 }
 0x761   : >> { %v2900_v40 = vmul.f32 0.03125, %v2898_v36 }
 0x763   : >> { %v2901_v42 = vsub.f32 %v2891_v38, %v2900_v40 }
 0x765   : >> { %v2902_v46 = vmul.f32 %v2901_v42, %v2901_v42 }
 0x767   : >> { %v2903_v24 = vsel %vm782_vm1, %v2902_v46, 0.0 }
 0x768   : >> { %2904 = vadd.xlane.f32.xlu1 %v2903_v24 }
 0x7f5   : >> { %v2905_v0 = vpop.xlane.xlu1 %2904 }
 0x7f6   : >> { %v2906_v15 = vmul.f32 0.03125, %v2905_v0 }
 0x7f8   : >> { %v2907_v50 = vadd.f32 1e-05, %v2906_v15  ;;  %v3141_v15 = vld [vmem:[%s5300_s6] sm:$0x1] (%p749_p1) }
 0x7fa   : >> { %3877 = vrsqrt.f32 %v2907_v50 }
 0x804   : >> { %v3878_v26 = vpop.eup %3877 }
 0x805   : >> { %v2909_v48 = vmul.f32 %v3878_v26, %v2901_v42 }
 0x807   : >> { %v2916_v34 = vmul.f32 %v3391_v39, %v2909_v48 }
 0x809   : >> { %v2923_v51 = vadd.f32 %v3392_v53, %v2916_v34 }
 0x80b   : >> { %v2924_v54 = vpack.c.bf16 %v2923_v51, %v2923_v51 }
 0x80d   : >> { %3643 = vmatmul.mubr.msk.bf16.vlgmr.msra.gmra.mrb[52].mxu0 %vm782_vm1, %v2924_v54 }
 0x8e0   : >> { %v2988_v12 = vpop.f32.mrb[52].mxu0 }
 0x8e1   : >> { %v2989_v59 = vadd.f32 %v3394_v58, %v2988_v12  ;;  %v3644_v60 = vpop.f32.mrb[53].mxu0 }
 0x8e2   : >> { %v2991_v61 = vpop.f32.mrb[54].mxu0 }
 0x8e3   : >> { %v2995_v5 = vmul.f32 0.044715, %v2989_v59  ;;  %v3645_v6 = vpop.f32.mrb[55].mxu0  ;;  %v2994_v2 = vmul.f32 0.5, %v2989_v59 }
 0x8e5   : >> { %v2996_v7 = vmul.f32 %v2995_v5, %v2989_v59 }
 0x8e7   : >> { %v2997_v8 = vmul.f32 %v2996_v7, %v2989_v59 }
 0x8e9   : >> { %v2998_v63 = vadd.f32 %v2997_v8, %v2989_v59 }
 0x8eb   : >> { %v2999_v3 = vmul.f32 0.7978846, %v2998_v63 }
 0x8ed   : >> { %3879 = vtanh.f32 %v2999_v3 }
 0x8f7   : >> { %v3880_v4 = vpop.eup %3879 }
 0x8f8   : >> { %v3001_v43 = vadd.f32 1.0, %v3880_v4 }
 0x8fa   : >> { %v3002_v9 = vmul.f32 %v3001_v43, %v2994_v2 }
 0x8fc   : >> { %v3003_v23 = vpack.c.bf16 %v3002_v9, %v3002_v9 }
 0x8fe   : >> { %3655 = vmatmul.mubr.msk.bf16.vlgmr.msra.gmra.mrb[52].mxu1 %vm3046_vm0, %v3003_v23 }
 0x9d1   : >> { %v3084_v22 = vpop.f32.mrb[52].mxu1 }
 0x9d2   : >> { %v3085_v11 = vadd.f32 %v3399_v10, %v3084_v22  ;;  %v3656_v13 = vpop.f32.mrb[53].mxu1 }
 0x9d3   : >> { %v3087_v41 = vpop.f32.mrb[54].mxu1 }
 0x9d4   : >> { %v3657_v32 = vpop.f32.mrb[55].mxu1  ;;  %v3090_v14 = vadd.f32 %v3085_v11, %v2923_v51 }
 0x9d6   : >> { %v3095_v19 = vsel %vm782_vm1, %v3090_v14, 0.0 }
 0x9d7   : >> { %3096 = vadd.xlane.f32.xlu0 %v3095_v19 }
 0xa64   : >> { %v3097_v16 = vpop.xlane.xlu0 %3096 }
 0xa65   : >> { %v3098_v45 = vmul.f32 0.03125, %v3097_v16 }
 0xa67   : >> { %v3099_v18 = vsub.f32 %v3090_v14, %v3098_v45 }
 0xa69   : >> { %v3100_v31 = vmul.f32 %v3099_v18, %v3099_v18 }
 0xa6b   : >> { %v3101_v21 = vsel %vm782_vm1, %v3100_v31, 0.0 }
 0xa6c   : >> { %3102 = vadd.xlane.f32.xlu0 %v3101_v21 }
 0xaf9   : >> { %v3103_v20 = vpop.xlane.xlu0 %3102 }
 0xafa   : >> { %v3104_v52 = vmul.f32 0.03125, %v3103_v20 }
 0xafc   : >> { %v3105_v27 = vadd.f32 1e-05, %v3104_v52 }
 0xafe   : >> { %3881 = vrsqrt.f32 %v3105_v27 }
 0xb08   : >> { %v3882_v28 = vpop.eup %3881 }
 0xb09   : >> { %v3107_v30 = vmul.f32 %v3882_v28, %v3099_v18  ;;  %751 = sbr.rel (!%p749_p1) target bundleno = 205 (0xcd), region = 202 }
 0xb0b   : >> { %v3114_v33 = vmul.f32 %v3405_v29, %v3107_v30 }
 0xb0d   : >> { %v3121_v17 = vadd.f32 %v3406_v44, %v3114_v33  }
 0xb0f   : >> { %v5297_v0 = vmov %v3121_v17  ;;  %v3123_v35 = vsel (%p749_p1), %vm782_vm1, %v3121_v17, 0.0  ;;  %vm3139_vm1 = vcmask (%p749_p1), 57344  }
 0xb10   : > { %3124 = vadd.xlane.f32.xlu0 %v3123_v35 }
 0xb9d   : > { %v3125_v38 = vpop.xlane.xlu0 %3124 }
 0xb9e   : > { %v3126_v62 = vmul.f32 0.03125, %v3125_v38 }
 0xba0   : > { %v3128_v36 = vmul.f32 %v3127_v25, %v3126_v62 }
 0xba2   : > { %v3130_v40 = vsel %vm1044_vm2, %v3128_v36, 0.0 }
 0xba3   : > { %v3131_v42 = vrot.slane %v3130_v40, 4 }
 0xba5   : > { %v3132_v46 = vadd.f32 %v3131_v42, %v3130_v40 }
 0xba7   : > { %v3133_v24 = vrot.slane %v3132_v46, 2 }
 0xba9   : > { %v3134_v47 = vadd.f32 %v3133_v24, %v3132_v46 }
 0xbab   : > { %v3135_v1 = vrot.slane %v3134_v47, 1 }
 0xbad   : > { %v3136_v0 = vadd.f32 %v3135_v1, %v3134_v47 }
 0xbaf   : > { %v3138_v50 = vadd.f32 %v3137_v49, %v3136_v0 }
 0xbb1   : > { %v3142_v26 = vsub.f32 %v3138_v50, %v3141_v15  ;;  %3140 = vst.msk [vmem:[%s5301_s27] sm:$0x1] %vm3139_vm1, %v3138_v50 }
 0xbb3   : > { %v3143_v39 = vmul.f32 %v3142_v26, %v3142_v26 }
 0xbb5   : > { %v3144_v48 = vsel %vm3139_vm1, %v3143_v39, 0.0 }
 0xbb6   : > { %3145 = vadd.xlane.f32.xlu0 %v3144_v48 }
 0xbb7   : > { %4040 = shalt.err (!%p4037_p9)
}
 0xbb8   : > { %s4041_s2 = scalar_lea.hbm %s5177_s11, 16  ;;  %s4045_s27 = scalar_lea.hbm %s5303_s26, 32 }
 0xbb9   : > { %p4042_p5 = scmp.ne.s32.totalorder %s5177_s11, %s4041_s2  ;;  %p4046_p7 = scmp.lt.u32.totalorder %s5177_s11, %s5303_s26 }
 0xbba   : > { %p4047_p12 = scmp.lt.u32.totalorder %s4045_s27, %s4041_s2  ;;  %p4049_p2 = scmp.lt.u32.totalorder %s4041_s2, %s5177_s11 }
 0xbbb   : > { %p4043_p11 = pnand %p4042_p5, %p5304_p4 }
 0xbbc   : > { %p4048_p1 = por %p4047_p12, %p4046_p7 }
 0xbbd   : > { %p4044_p3 = pneg %p4043_p11 }
 0xbbe   : > { %p4050_p0 = por %p4049_p2, %p4048_p1 }
 0xbc0   : > { %p4051_p8 = pnand %p4050_p0, %p4044_p3 }
 0xbc2   : > { %4054 = shalt.err (!%p4051_p8)
}
 0xbc3   : > { %3674 = dma.vmem_to_hbm [thread:$0]  (%p5304_p4), %s3166_s3, 16, %s5177_s11, %s3150_s28   ;;  %vm3147_vm2 = vcmask 0  }
 0xbc4   : > { %s5305_s15 = scalar_lea.vmem %s5240_s20, %s4509_s0 }
 0xc43   : > { %v3146_v53 = vpop.xlane.xlu0 %3145 }
 0xc44   : > { %3148 = vst.msk [vmem:[%s5305_s15] sm:$0x1] %vm3147_vm2, %v3146_v53 }
 0xc45 PF: > { %s5306_s9 = sld [smem:[#allocation17_spill]]  ;;  %s5307_s29 = sld [smem:[#allocation18_spill]] }
 0xc46   : > { %p5309_p10 = scmp.ge.s32.totalorder %s4113_s24, 2 }
 0xc4b   : > { %s3180_s4 = sand.u32 1, %s5306_s9   ;;  %p5308_p6 = scmp.ne.s32.totalorder %s5307_s29, 0 }
 0xc4c   : > { %s3181_s2 = scalar_lea.sflag [#allocation4], %s3180_s4 }
 0xc4d   : > { %p3694_p13 = pnand %p5309_p10, %p5308_p6 }
 0xc4f   : > { %4096 = dma.done.wait (!%p3694_p13), %s3181_s2, 16  }
 0xc50   : > { %4098 = vsyncadd (!%p3694_p13), %s3181_s2, 4294967280  ;;  %p38_p4 = scmp.ge.s32.totalorder %s4393_s14, 4   ;;  %s5310_s1 = smov %s4105_s22 }
 0xc51   : > { %s5311_s22 = smov %s4109_s23  ;;  %s5312_s23 = smov %s4403_s13 }
 0xc52   : > { %s5313_s24 = smov %s4393_s14  ;;  %40 = sbr.rel (!%p38_p4) target bundleno = 24 (0x18), region = 213 }
 0xc59   :  { %3191 = vsyncpa [#allocation3], 1 }
 0xc5a   :  { %3193 = vsyncpa [#allocation3 + $0x1], 1 }
 0xc5b   :  { %3194 = vsyncpa [#allocation6], 1 }
 0xc5c   :  { %3196 = vsyncpa [#allocation6 + $0x1], 1 }
 0xc5d   :  { %3197 = vsyncpa [#allocation9], 1 }
 0xc5e   :  { %3198 = vsyncpa [#allocation4], 1 }
 0xc5f   :  { %3200 = vsyncpa [#allocation4 + $0x1], 1 }

</bundles_post_ra>
